<compile_context>
chip_gen: v7x
topology: tpu7x:2x2x1
jax: 0.10.0
libtpu: 0.0.40
codegen_flags: <defaults>
</compile_context>

<pallas_src>
import numpy as np
import jax
import jax.numpy as jnp
from jax import lax
from jax.experimental import pallas as pl
from jax.experimental.pallas import tpu as pltpu

# ----- configuration (mirrors CFG.out_ch1 / CFG.out_ch2 of the module) -----
CHAR_VOCAB = 68
EMB = int(np.log2(CHAR_VOCAB)) + 1          # 7  (as in the module __init__)
OUT_CH1 = 16
OUT_CH2 = 48                                # divisible by 3 -> C2 = 16
C2 = OUT_CH2 // 3
K1 = 3
K2S = (3, 4, 5)
K2MAX = max(K2S)                            # 5


def char2vec_kernel(ids_ref, w1f_ref, w2_ref, wl_ref, bias_ref, o_ref):
    seq, tn = ids_ref.shape                            # (SEQ, TN) int32 block
    l1 = seq - K1 + 1                                  # conv1 output length
    l2 = l1 - K2S[0] + 1                               # fused conv2 window count

    # ---- one-hot of char ids, lane-dense: columns = (position, batch) with
    #      batch minor.  Built per position (aligned lane concat, no reshape).
    ids = ids_ref[...]                                 # (seq, tn)
    cvoc = lax.broadcasted_iota(jnp.int32, (CHAR_VOCAB, tn), 0)
    onehot = jnp.concatenate(
        [(cvoc == ids[s:s + 1, :]).astype(jnp.float32) for s in range(seq)],
        axis=1)                                        # (68, seq*tn)

    # ---- conv1: embedding + bias already folded into w1f (48, 68).
    #      One matmul, then three lane-aligned shifted-slice adds (the taps).
    z = jnp.dot(w1f_ref[...], onehot,
                preferred_element_type=jnp.float32)    # (K1*16, seq*tn)
    y1 = (z[0 * OUT_CH1:1 * OUT_CH1, 0 * tn:(l1 + 0) * tn]
          + z[1 * OUT_CH1:2 * OUT_CH1, 1 * tn:(l1 + 1) * tn]
          + z[2 * OUT_CH1:3 * OUT_CH1, 2 * tn:(l1 + 2) * tn])
    y1 = jnp.maximum(y1, 0.0)                          # (16, l1*tn); Dropout(0.1)=id at eval

    # pad two phantom positions so all three conv2 branches share a K=5 window
    y1p = jnp.concatenate(
        [y1, jnp.zeros((OUT_CH1, (K2MAX - K2S[0]) * tn), jnp.float32)],
        axis=1)                                        # (16, (l1+2)*tn)

    # ---- conv2 (branches k=3/4/5 stacked on the output-channel axis):
    #      5 accumulating matmuls over lane-aligned shifted slices.
    w2 = w2_ref[...]                                   # (5, 48, 16)
    y2 = jnp.dot(w2[0], y1p[:, 0:l2 * tn],
                 preferred_element_type=jnp.float32)   # (48, l2*tn)
    for k in range(1, K2MAX):
        y2 = y2 + jnp.dot(w2[k], y1p[:, k * tn:(k + l2) * tn],
                          preferred_element_type=jnp.float32)

    # ---- max-pool over positions.  Branch i (rows i*16:(i+1)*16) is only
    #      valid for p < l2 - i; exclude phantom positions with a row select.
    row = lax.broadcasted_iota(jnp.int32, (OUT_CH2, tn), 0)
    acc = y2[:, 0:tn]
    for p in range(1, l2):
        sl = y2[:, p * tn:(p + 1) * tn]
        nvalid = C2 * (l2 - p)                         # rows still valid at p
        if nvalid >= OUT_CH2:
            acc = jnp.maximum(acc, sl)
        else:
            acc = jnp.where(row < nvalid, jnp.maximum(acc, sl), acc)

    # bias-add and ReLU are monotone, so they commute with the max-pool:
    # applied here on the small (48, tn) tile instead of (48, l2*tn).
    b2 = bias_ref[:, 0:1]                              # (48, 1) conv2 bias
    bl = bias_ref[:, 1:2]                              # (48, 1) linear bias
    conv2 = jnp.maximum(acc + b2, 0.0)                 # (48, tn)

    lin = jnp.maximum(
        jnp.dot(wl_ref[...], conv2, preferred_element_type=jnp.float32) + bl,
        0.0)
    o_ref[...] = lin + conv2                           # lane-dense (48, tn) store


def char2vec_forward(word, params, tn=512):
    """word: (B, SENT, SEQ) int char ids.  Returns (B, SENT, OUT_CH2) f32."""
    B, SENT, SEQ = word.shape
    assert SEQ >= K1 + K2MAX - 1, "SEQ must be >= 7 for the k=5 conv branch"
    N = B * SENT

    # ids laid out (SEQ, N) so the batch dim is the lane axis of the block
    ids = word.reshape(N, SEQ).astype(jnp.int32).T     # (SEQ, N)

    tn_eff = int(min(tn, ((N + 127) // 128) * 128))
    tn_eff = max(128, (tn_eff // 128) * 128)           # multiple of 128
    n_pad = ((N + tn_eff - 1) // tn_eff) * tn_eff
    if n_pad != N:
        ids = jnp.concatenate(
            [ids, jnp.zeros((SEQ, n_pad - N), jnp.int32)], axis=1)

    # ---- glue: fold the embedding table + conv1 bias into the conv1 weights.
    #      w1f[k*16+o, c] = sum_e embed[c,e] * w1_pt[o,e,k]  (+ b1[o] on tap 0;
    #      valid because each one-hot column sums to exactly 1).
    embed = params["embed"].astype(jnp.float32)
    w1f = jnp.einsum("ce,oek->koc", embed, params["w1_pt"])       # (3, 16, 68)
    w1f = w1f.at[0].add(params["b1"][:, None])
    w1f = w1f.reshape(K1 * OUT_CH1, CHAR_VOCAB)                   # (48, 68)

    # conv2 taps, branches stacked along the output-channel axis, zero-padded
    # to K=5 taps: w2[k, i*16+o2, c1] = w2_pt_i[o2, c1, k] for k < K2S[i].
    w2 = jnp.zeros((K2MAX, OUT_CH2, OUT_CH1), jnp.float32)
    for i, kk in enumerate(K2S):
        w2 = w2.at[:kk, i * C2:(i + 1) * C2, :].set(
            jnp.transpose(params[f"w2_{kk}_pt"], (2, 0, 1)))      # (kk, 16, 16)

    b2 = jnp.concatenate([params[f"b2_{kk}"] for kk in K2S])      # (48,)
    bias = jnp.stack([b2, params["bl"]], axis=1)                  # (48, 2)
    wl = params["wl_pt"]                                          # (48, 48), used as LHS

    out = pl.pallas_call(
        char2vec_kernel,
        out_shape=jax.ShapeDtypeStruct((OUT_CH2, n_pad), jnp.float32),
        grid_spec=pltpu.PrefetchScalarGridSpec(
            num_scalar_prefetch=0,
            grid=(n_pad // tn_eff,),
            in_specs=[
                pl.BlockSpec((SEQ, tn_eff), lambda i: (0, i)),
                pl.BlockSpec(w1f.shape, lambda i: (0, 0)),
                pl.BlockSpec(w2.shape, lambda i: (0, 0, 0)),
                pl.BlockSpec(wl.shape, lambda i: (0, 0)),
                pl.BlockSpec(bias.shape, lambda i: (0, 0)),
            ],
            out_specs=pl.BlockSpec((OUT_CH2, tn_eff), lambda i: (0, i)),
        ),
        compiler_params=pltpu.CompilerParams(
            dimension_semantics=("parallel",),
            vmem_limit_bytes=32 * 1024 * 1024),
    )(ids, w1f, w2, wl, bias)

    # output is a lane-dense (48, n_pad) slab -> one cheap wrapper transpose
    return out[:, :N].T.reshape(B, SENT, OUT_CH2)


def char2vec_reference(word, params):
    """Pure-JAX f32 reference mirroring the PyTorch (NCW) semantics."""
    B, SENT, SEQ = word.shape
    N = B * SENT
    prec = lax.Precision.HIGHEST
    x = jnp.take(params["embed"], word.reshape(N, SEQ), axis=0)    # (N, SEQ, E)
    x_ncw = jnp.transpose(x, (0, 2, 1))                            # (N, E, SEQ)

    def conv(inp, w_oik, b):
        y = lax.conv_general_dilated(
            inp, w_oik, (1,), "VALID",
            dimension_numbers=("NCH", "OIH", "NCH"), precision=prec)
        return y + b[None, :, None]

    y1 = jnp.maximum(conv(x_ncw, params["w1_pt"], params["b1"]), 0.0)
    pooled = []
    for k in K2S:
        y2 = jnp.maximum(conv(y1, params[f"w2_{k}_pt"], params[f"b2_{k}"]), 0.0)
        pooled.append(jnp.max(y2, axis=-1))
    conv2 = jnp.concatenate(pooled, axis=1)
    lin = jnp.maximum(
        jnp.dot(conv2, params["wl_pt"].T, precision=prec) + params["bl"], 0.0)
    return (lin + conv2).reshape(B, SENT, -1)


def make_params(key):
    ks = jax.random.split(key, 11)
    p = {}
    embed = jax.random.normal(ks[0], (CHAR_VOCAB, EMB), jnp.float32) * 0.5
    p["embed"] = embed.at[0].set(0.0)                 # padding_idx=0
    p["w1_pt"] = jax.random.normal(ks[1], (OUT_CH1, EMB, K1), jnp.float32) * 0.2
    p["b1"] = jax.random.normal(ks[2], (OUT_CH1,), jnp.float32) * 0.1
    for i, k in enumerate(K2S):
        p[f"w2_{k}_pt"] = jax.random.normal(
            ks[3 + 2 * i], (C2, OUT_CH1, k), jnp.float32) * 0.2
        p[f"b2_{k}"] = jax.random.normal(
            ks[4 + 2 * i], (C2,), jnp.float32) * 0.1
    p["wl_pt"] = jax.random.normal(ks[9], (OUT_CH2, OUT_CH2), jnp.float32) * 0.1
    p["bl"] = jax.random.normal(ks[10], (OUT_CH2,), jnp.float32) * 0.1
    return p


if __name__ == "__main__":
    key = jax.random.PRNGKey(0)
    k_params, k_word = jax.random.split(key)
    params = make_params(k_params)

    B, SENT, SEQ = 2, 8, 16
    word = jax.random.randint(k_word, (B, SENT, SEQ), 0, CHAR_VOCAB,
                              dtype=jnp.int32)

    out = jax.block_until_ready(char2vec_forward(word, params))
    ref = jax.block_until_ready(char2vec_reference(word, params))

    # kernel uses default (single-pass bf16) MXU precision with f32 accumulate
    # against an f32 HIGHEST-precision reference -> allow a few e-2 of drift
    np.testing.assert_allclose(np.asarray(out), np.asarray(ref),
                               rtol=5e-2, atol=5e-2)
    assert out.shape == (B, SENT, OUT_CH2)
    print("KERNEL_OK")
</pallas_src>

<mosaic_0001>
module attributes {stable_mosaic.version = 11 : i64} {
  func.func @char2vec_kernel(%arg0: i32, %arg1: memref<16x128xi32, #tpu.memory_space<vmem>>, %arg2: memref<48x68xf32, #tpu.memory_space<vmem>>, %arg3: memref<5x48x16xf32, #tpu.memory_space<vmem>>, %arg4: memref<48x48xf32, #tpu.memory_space<vmem>>, %arg5: memref<48x2xf32, #tpu.memory_space<vmem>>, %arg6: memref<48x128xf32, #tpu.memory_space<vmem>>) attributes {dimension_semantics = [#tpu.dimension_semantics<parallel>], iteration_bounds = array<i64: 1>, scalar_prefetch = 0 : i64, scratch_operands = 0 : i64, tpu.core_type = #tpu.core_type<tc>, window_params = [{transform_indices = @transform_0, window_bounds = array<i64: 16, 128>}, {pipeline_mode = #tpu.pipeline_mode<synchronous>, transform_indices = @transform_1, window_bounds = array<i64: 48, 68>}, {pipeline_mode = #tpu.pipeline_mode<synchronous>, transform_indices = @transform_2, window_bounds = array<i64: 5, 48, 16>}, {pipeline_mode = #tpu.pipeline_mode<synchronous>, transform_indices = @transform_3, window_bounds = array<i64: 48, 48>}, {pipeline_mode = #tpu.pipeline_mode<synchronous>, transform_indices = @transform_4, window_bounds = array<i64: 48, 2>}, {transform_indices = @transform_5, window_bounds = array<i64: 48, 128>}]} {
    %c0 = arith.constant 0 : index
    %c0_0 = arith.constant 0 : index
    %0 = vector.load %arg1[%c0, %c0_0] : memref<16x128xi32, #tpu.memory_space<vmem>>, vector<16x128xi32>
    %1 = tpu.iota {dimensions = array<i32: 0>} : vector<68x128xi32>
    %2 = vector.extract_strided_slice %0 {offsets = [0, 0], sizes = [1, 128], strides = [1, 1]} : vector<16x128xi32> to vector<1x128xi32>
    %3 = vector.broadcast %2 : vector<1x128xi32> to vector<68x128xi32>
    %4 = arith.cmpi eq, %1, %3 : vector<68x128xi32>
    %5 = arith.extui %4 : vector<68x128xi1> to vector<68x128xi32>
    %6 = arith.sitofp %5 : vector<68x128xi32> to vector<68x128xf32>
    %7 = vector.extract_strided_slice %0 {offsets = [1, 0], sizes = [1, 128], strides = [1, 1]} : vector<16x128xi32> to vector<1x128xi32>
    %8 = vector.broadcast %7 : vector<1x128xi32> to vector<68x128xi32>
    %9 = arith.cmpi eq, %1, %8 : vector<68x128xi32>
    %10 = arith.extui %9 : vector<68x128xi1> to vector<68x128xi32>
    %11 = arith.sitofp %10 : vector<68x128xi32> to vector<68x128xf32>
    %12 = vector.extract_strided_slice %0 {offsets = [2, 0], sizes = [1, 128], strides = [1, 1]} : vector<16x128xi32> to vector<1x128xi32>
    %13 = vector.broadcast %12 : vector<1x128xi32> to vector<68x128xi32>
    %14 = arith.cmpi eq, %1, %13 : vector<68x128xi32>
    %15 = arith.extui %14 : vector<68x128xi1> to vector<68x128xi32>
    %16 = arith.sitofp %15 : vector<68x128xi32> to vector<68x128xf32>
    %17 = vector.extract_strided_slice %0 {offsets = [3, 0], sizes = [1, 128], strides = [1, 1]} : vector<16x128xi32> to vector<1x128xi32>
    %18 = vector.broadcast %17 : vector<1x128xi32> to vector<68x128xi32>
    %19 = arith.cmpi eq, %1, %18 : vector<68x128xi32>
    %20 = arith.extui %19 : vector<68x128xi1> to vector<68x128xi32>
    %21 = arith.sitofp %20 : vector<68x128xi32> to vector<68x128xf32>
    %22 = vector.extract_strided_slice %0 {offsets = [4, 0], sizes = [1, 128], strides = [1, 1]} : vector<16x128xi32> to vector<1x128xi32>
    %23 = vector.broadcast %22 : vector<1x128xi32> to vector<68x128xi32>
    %24 = arith.cmpi eq, %1, %23 : vector<68x128xi32>
    %25 = arith.extui %24 : vector<68x128xi1> to vector<68x128xi32>
    %26 = arith.sitofp %25 : vector<68x128xi32> to vector<68x128xf32>
    %27 = vector.extract_strided_slice %0 {offsets = [5, 0], sizes = [1, 128], strides = [1, 1]} : vector<16x128xi32> to vector<1x128xi32>
    %28 = vector.broadcast %27 : vector<1x128xi32> to vector<68x128xi32>
    %29 = arith.cmpi eq, %1, %28 : vector<68x128xi32>
    %30 = arith.extui %29 : vector<68x128xi1> to vector<68x128xi32>
    %31 = arith.sitofp %30 : vector<68x128xi32> to vector<68x128xf32>
    %32 = vector.extract_strided_slice %0 {offsets = [6, 0], sizes = [1, 128], strides = [1, 1]} : vector<16x128xi32> to vector<1x128xi32>
    %33 = vector.broadcast %32 : vector<1x128xi32> to vector<68x128xi32>
    %34 = arith.cmpi eq, %1, %33 : vector<68x128xi32>
    %35 = arith.extui %34 : vector<68x128xi1> to vector<68x128xi32>
    %36 = arith.sitofp %35 : vector<68x128xi32> to vector<68x128xf32>
    %37 = vector.extract_strided_slice %0 {offsets = [7, 0], sizes = [1, 128], strides = [1, 1]} : vector<16x128xi32> to vector<1x128xi32>
    %38 = vector.broadcast %37 : vector<1x128xi32> to vector<68x128xi32>
    %39 = arith.cmpi eq, %1, %38 : vector<68x128xi32>
    %40 = arith.extui %39 : vector<68x128xi1> to vector<68x128xi32>
    %41 = arith.sitofp %40 : vector<68x128xi32> to vector<68x128xf32>
    %42 = vector.extract_strided_slice %0 {offsets = [8, 0], sizes = [1, 128], strides = [1, 1]} : vector<16x128xi32> to vector<1x128xi32>
    %43 = vector.broadcast %42 : vector<1x128xi32> to vector<68x128xi32>
    %44 = arith.cmpi eq, %1, %43 : vector<68x128xi32>
    %45 = arith.extui %44 : vector<68x128xi1> to vector<68x128xi32>
    %46 = arith.sitofp %45 : vector<68x128xi32> to vector<68x128xf32>
    %47 = vector.extract_strided_slice %0 {offsets = [9, 0], sizes = [1, 128], strides = [1, 1]} : vector<16x128xi32> to vector<1x128xi32>
    %48 = vector.broadcast %47 : vector<1x128xi32> to vector<68x128xi32>
    %49 = arith.cmpi eq, %1, %48 : vector<68x128xi32>
    %50 = arith.extui %49 : vector<68x128xi1> to vector<68x128xi32>
    %51 = arith.sitofp %50 : vector<68x128xi32> to vector<68x128xf32>
    %52 = vector.extract_strided_slice %0 {offsets = [10, 0], sizes = [1, 128], strides = [1, 1]} : vector<16x128xi32> to vector<1x128xi32>
    %53 = vector.broadcast %52 : vector<1x128xi32> to vector<68x128xi32>
    %54 = arith.cmpi eq, %1, %53 : vector<68x128xi32>
    %55 = arith.extui %54 : vector<68x128xi1> to vector<68x128xi32>
    %56 = arith.sitofp %55 : vector<68x128xi32> to vector<68x128xf32>
    %57 = vector.extract_strided_slice %0 {offsets = [11, 0], sizes = [1, 128], strides = [1, 1]} : vector<16x128xi32> to vector<1x128xi32>
    %58 = vector.broadcast %57 : vector<1x128xi32> to vector<68x128xi32>
    %59 = arith.cmpi eq, %1, %58 : vector<68x128xi32>
    %60 = arith.extui %59 : vector<68x128xi1> to vector<68x128xi32>
    %61 = arith.sitofp %60 : vector<68x128xi32> to vector<68x128xf32>
    %62 = vector.extract_strided_slice %0 {offsets = [12, 0], sizes = [1, 128], strides = [1, 1]} : vector<16x128xi32> to vector<1x128xi32>
    %63 = vector.broadcast %62 : vector<1x128xi32> to vector<68x128xi32>
    %64 = arith.cmpi eq, %1, %63 : vector<68x128xi32>
    %65 = arith.extui %64 : vector<68x128xi1> to vector<68x128xi32>
    %66 = arith.sitofp %65 : vector<68x128xi32> to vector<68x128xf32>
    %67 = vector.extract_strided_slice %0 {offsets = [13, 0], sizes = [1, 128], strides = [1, 1]} : vector<16x128xi32> to vector<1x128xi32>
    %68 = vector.broadcast %67 : vector<1x128xi32> to vector<68x128xi32>
    %69 = arith.cmpi eq, %1, %68 : vector<68x128xi32>
    %70 = arith.extui %69 : vector<68x128xi1> to vector<68x128xi32>
    %71 = arith.sitofp %70 : vector<68x128xi32> to vector<68x128xf32>
    %72 = vector.extract_strided_slice %0 {offsets = [14, 0], sizes = [1, 128], strides = [1, 1]} : vector<16x128xi32> to vector<1x128xi32>
    %73 = vector.broadcast %72 : vector<1x128xi32> to vector<68x128xi32>
    %74 = arith.cmpi eq, %1, %73 : vector<68x128xi32>
    %75 = arith.extui %74 : vector<68x128xi1> to vector<68x128xi32>
    %76 = arith.sitofp %75 : vector<68x128xi32> to vector<68x128xf32>
    %77 = vector.extract_strided_slice %0 {offsets = [15, 0], sizes = [1, 128], strides = [1, 1]} : vector<16x128xi32> to vector<1x128xi32>
    %78 = vector.broadcast %77 : vector<1x128xi32> to vector<68x128xi32>
    %79 = arith.cmpi eq, %1, %78 : vector<68x128xi32>
    %80 = arith.extui %79 : vector<68x128xi1> to vector<68x128xi32>
    %81 = arith.sitofp %80 : vector<68x128xi32> to vector<68x128xf32>
    %82 = tpu.concatenate %6, %11, %16, %21, %26, %31, %36, %41, %46, %51, %56, %61, %66, %71, %76, %81 in 1 : vector<68x128xf32>, vector<68x128xf32>, vector<68x128xf32>, vector<68x128xf32>, vector<68x128xf32>, vector<68x128xf32>, vector<68x128xf32>, vector<68x128xf32>, vector<68x128xf32>, vector<68x128xf32>, vector<68x128xf32>, vector<68x128xf32>, vector<68x128xf32>, vector<68x128xf32>, vector<68x128xf32>, vector<68x128xf32> -> vector<68x2048xf32>
    %c0_1 = arith.constant 0 : index
    %c0_2 = arith.constant 0 : index
    %83 = vector.load %arg2[%c0_1, %c0_2] : memref<48x68xf32, #tpu.memory_space<vmem>>, vector<48x68xf32>
    %cst = arith.constant dense<0.000000e+00> : vector<48x2048xf32>
    %84 = tpu.matmul %83, %82, %cst {dimension_numbers = #tpu.dot_dimension_numbers<[1], [0], [0], [1], [0, 0, 1, 1], [], []>} : vector<48x68xf32>, vector<68x2048xf32>, vector<48x2048xf32> -> vector<48x2048xf32>
    %85 = vector.extract_strided_slice %84 {offsets = [0, 0], sizes = [16, 1792], strides = [1, 1]} : vector<48x2048xf32> to vector<16x1792xf32>
    %86 = vector.extract_strided_slice %84 {offsets = [16, 128], sizes = [16, 1792], strides = [1, 1]} : vector<48x2048xf32> to vector<16x1792xf32>
    %87 = arith.addf %85, %86 : vector<16x1792xf32>
    %88 = vector.extract_strided_slice %84 {offsets = [32, 256], sizes = [16, 1792], strides = [1, 1]} : vector<48x2048xf32> to vector<16x1792xf32>
    %89 = arith.addf %87, %88 : vector<16x1792xf32>
    %cst_3 = arith.constant 0.000000e+00 : f32
    %90 = vector.broadcast %cst_3 : f32 to vector<16x1792xf32>
    %91 = arith.maximumf %89, %90 : vector<16x1792xf32>
    %cst_4 = arith.constant 0.000000e+00 : f32
    %92 = vector.broadcast %cst_4 : f32 to vector<16x256xf32>
    %93 = tpu.concatenate %91, %92 in 1 : vector<16x1792xf32>, vector<16x256xf32> -> vector<16x2048xf32>
    %c0_5 = arith.constant 0 : index
    %c0_6 = arith.constant 0 : index
    %c0_7 = arith.constant 0 : index
    %94 = vector.load %arg3[%c0_5, %c0_6, %c0_7] : memref<5x48x16xf32, #tpu.memory_space<vmem>>, vector<5x48x16xf32>
    %95 = vector.extract_strided_slice %94 {offsets = [0, 0, 0], sizes = [1, 48, 16], strides = [1, 1, 1]} : vector<5x48x16xf32> to vector<1x48x16xf32>
    %96 = vector.shape_cast %95 : vector<1x48x16xf32> to vector<48x16xf32>
    %97 = vector.extract_strided_slice %93 {offsets = [0, 0], sizes = [16, 1536], strides = [1, 1]} : vector<16x2048xf32> to vector<16x1536xf32>
    %cst_8 = arith.constant dense<0.000000e+00> : vector<48x1536xf32>
    %98 = tpu.matmul %96, %97, %cst_8 {dimension_numbers = #tpu.dot_dimension_numbers<[1], [0], [0], [1], [0, 0, 1, 1], [], []>} : vector<48x16xf32>, vector<16x1536xf32>, vector<48x1536xf32> -> vector<48x1536xf32>
    %99 = vector.extract_strided_slice %94 {offsets = [1, 0, 0], sizes = [1, 48, 16], strides = [1, 1, 1]} : vector<5x48x16xf32> to vector<1x48x16xf32>
    %100 = vector.shape_cast %99 : vector<1x48x16xf32> to vector<48x16xf32>
    %101 = vector.extract_strided_slice %93 {offsets = [0, 128], sizes = [16, 1536], strides = [1, 1]} : vector<16x2048xf32> to vector<16x1536xf32>
    %cst_9 = arith.constant dense<0.000000e+00> : vector<48x1536xf32>
    %102 = tpu.matmul %100, %101, %cst_9 {dimension_numbers = #tpu.dot_dimension_numbers<[1], [0], [0], [1], [0, 0, 1, 1], [], []>} : vector<48x16xf32>, vector<16x1536xf32>, vector<48x1536xf32> -> vector<48x1536xf32>
    %103 = arith.addf %98, %102 : vector<48x1536xf32>
    %104 = vector.extract_strided_slice %94 {offsets = [2, 0, 0], sizes = [1, 48, 16], strides = [1, 1, 1]} : vector<5x48x16xf32> to vector<1x48x16xf32>
    %105 = vector.shape_cast %104 : vector<1x48x16xf32> to vector<48x16xf32>
    %106 = vector.extract_strided_slice %93 {offsets = [0, 256], sizes = [16, 1536], strides = [1, 1]} : vector<16x2048xf32> to vector<16x1536xf32>
    %cst_10 = arith.constant dense<0.000000e+00> : vector<48x1536xf32>
    %107 = tpu.matmul %105, %106, %cst_10 {dimension_numbers = #tpu.dot_dimension_numbers<[1], [0], [0], [1], [0, 0, 1, 1], [], []>} : vector<48x16xf32>, vector<16x1536xf32>, vector<48x1536xf32> -> vector<48x1536xf32>
    %108 = arith.addf %103, %107 : vector<48x1536xf32>
    %109 = vector.extract_strided_slice %94 {offsets = [3, 0, 0], sizes = [1, 48, 16], strides = [1, 1, 1]} : vector<5x48x16xf32> to vector<1x48x16xf32>
    %110 = vector.shape_cast %109 : vector<1x48x16xf32> to vector<48x16xf32>
    %111 = vector.extract_strided_slice %93 {offsets = [0, 384], sizes = [16, 1536], strides = [1, 1]} : vector<16x2048xf32> to vector<16x1536xf32>
    %cst_11 = arith.constant dense<0.000000e+00> : vector<48x1536xf32>
    %112 = tpu.matmul %110, %111, %cst_11 {dimension_numbers = #tpu.dot_dimension_numbers<[1], [0], [0], [1], [0, 0, 1, 1], [], []>} : vector<48x16xf32>, vector<16x1536xf32>, vector<48x1536xf32> -> vector<48x1536xf32>
    %113 = arith.addf %108, %112 : vector<48x1536xf32>
    %114 = vector.extract_strided_slice %94 {offsets = [4, 0, 0], sizes = [1, 48, 16], strides = [1, 1, 1]} : vector<5x48x16xf32> to vector<1x48x16xf32>
    %115 = vector.shape_cast %114 : vector<1x48x16xf32> to vector<48x16xf32>
    %116 = vector.extract_strided_slice %93 {offsets = [0, 512], sizes = [16, 1536], strides = [1, 1]} : vector<16x2048xf32> to vector<16x1536xf32>
    %cst_12 = arith.constant dense<0.000000e+00> : vector<48x1536xf32>
    %117 = tpu.matmul %115, %116, %cst_12 {dimension_numbers = #tpu.dot_dimension_numbers<[1], [0], [0], [1], [0, 0, 1, 1], [], []>} : vector<48x16xf32>, vector<16x1536xf32>, vector<48x1536xf32> -> vector<48x1536xf32>
    %118 = arith.addf %113, %117 : vector<48x1536xf32>
    %119 = tpu.iota {dimensions = array<i32: 0>} : vector<48x128xi32>
    %120 = vector.extract_strided_slice %118 {offsets = [0, 0], sizes = [48, 128], strides = [1, 1]} : vector<48x1536xf32> to vector<48x128xf32>
    %121 = vector.extract_strided_slice %118 {offsets = [0, 128], sizes = [48, 128], strides = [1, 1]} : vector<48x1536xf32> to vector<48x128xf32>
    %122 = arith.maximumf %120, %121 : vector<48x128xf32>
    %123 = vector.extract_strided_slice %118 {offsets = [0, 256], sizes = [48, 128], strides = [1, 1]} : vector<48x1536xf32> to vector<48x128xf32>
    %124 = arith.maximumf %122, %123 : vector<48x128xf32>
    %125 = vector.extract_strided_slice %118 {offsets = [0, 384], sizes = [48, 128], strides = [1, 1]} : vector<48x1536xf32> to vector<48x128xf32>
    %126 = arith.maximumf %124, %125 : vector<48x128xf32>
    %127 = vector.extract_strided_slice %118 {offsets = [0, 512], sizes = [48, 128], strides = [1, 1]} : vector<48x1536xf32> to vector<48x128xf32>
    %128 = arith.maximumf %126, %127 : vector<48x128xf32>
    %129 = vector.extract_strided_slice %118 {offsets = [0, 640], sizes = [48, 128], strides = [1, 1]} : vector<48x1536xf32> to vector<48x128xf32>
    %130 = arith.maximumf %128, %129 : vector<48x128xf32>
    %131 = vector.extract_strided_slice %118 {offsets = [0, 768], sizes = [48, 128], strides = [1, 1]} : vector<48x1536xf32> to vector<48x128xf32>
    %132 = arith.maximumf %130, %131 : vector<48x128xf32>
    %133 = vector.extract_strided_slice %118 {offsets = [0, 896], sizes = [48, 128], strides = [1, 1]} : vector<48x1536xf32> to vector<48x128xf32>
    %134 = arith.maximumf %132, %133 : vector<48x128xf32>
    %135 = vector.extract_strided_slice %118 {offsets = [0, 1024], sizes = [48, 128], strides = [1, 1]} : vector<48x1536xf32> to vector<48x128xf32>
    %136 = arith.maximumf %134, %135 : vector<48x128xf32>
    %137 = vector.extract_strided_slice %118 {offsets = [0, 1152], sizes = [48, 128], strides = [1, 1]} : vector<48x1536xf32> to vector<48x128xf32>
    %138 = arith.maximumf %136, %137 : vector<48x128xf32>
    %139 = vector.extract_strided_slice %118 {offsets = [0, 1280], sizes = [48, 128], strides = [1, 1]} : vector<48x1536xf32> to vector<48x128xf32>
    %c32_i32 = arith.constant 32 : i32
    %140 = vector.broadcast %c32_i32 : i32 to vector<48x128xi32>
    %141 = arith.cmpi slt, %119, %140 : vector<48x128xi32>
    %142 = arith.maximumf %138, %139 : vector<48x128xf32>
    %143 = arith.select %141, %142, %138 : vector<48x128xi1>, vector<48x128xf32>
    %144 = vector.extract_strided_slice %118 {offsets = [0, 1408], sizes = [48, 128], strides = [1, 1]} : vector<48x1536xf32> to vector<48x128xf32>
    %c16_i32 = arith.constant 16 : i32
    %145 = vector.broadcast %c16_i32 : i32 to vector<48x128xi32>
    %146 = arith.cmpi slt, %119, %145 : vector<48x128xi32>
    %147 = arith.maximumf %143, %144 : vector<48x128xf32>
    %148 = arith.select %146, %147, %143 : vector<48x128xi1>, vector<48x128xf32>
    %c0_13 = arith.constant 0 : index
    %c0_14 = arith.constant 0 : index
    %149 = vector.load %arg5[%c0_13, %c0_14] : memref<48x2xf32, #tpu.memory_space<vmem>>, vector<48x1xf32>
    %c0_15 = arith.constant 0 : index
    %c1 = arith.constant 1 : index
    %150 = vector.load %arg5[%c0_15, %c1] : memref<48x2xf32, #tpu.memory_space<vmem>>, vector<48x1xf32>
    %151 = vector.broadcast %149 : vector<48x1xf32> to vector<48x128xf32>
    %152 = arith.addf %148, %151 : vector<48x128xf32>
    %cst_16 = arith.constant 0.000000e+00 : f32
    %153 = vector.broadcast %cst_16 : f32 to vector<48x128xf32>
    %154 = arith.maximumf %152, %153 : vector<48x128xf32>
    %c0_17 = arith.constant 0 : index
    %c0_18 = arith.constant 0 : index
    %155 = vector.load %arg4[%c0_17, %c0_18] : memref<48x48xf32, #tpu.memory_space<vmem>>, vector<48x48xf32>
    %cst_19 = arith.constant dense<0.000000e+00> : vector<48x128xf32>
    %156 = tpu.matmul %155, %154, %cst_19 {dimension_numbers = #tpu.dot_dimension_numbers<[1], [0], [0], [1], [0, 0, 1, 1], [], []>} : vector<48x48xf32>, vector<48x128xf32>, vector<48x128xf32> -> vector<48x128xf32>
    %157 = vector.broadcast %150 : vector<48x1xf32> to vector<48x128xf32>
    %158 = arith.addf %156, %157 : vector<48x128xf32>
    %cst_20 = arith.constant 0.000000e+00 : f32
    %159 = vector.broadcast %cst_20 : f32 to vector<48x128xf32>
    %160 = arith.maximumf %158, %159 : vector<48x128xf32>
    %161 = arith.addf %160, %154 : vector<48x128xf32>
    %c0_21 = arith.constant 0 : index
    %c0_22 = arith.constant 0 : index
    %162 = vector.load %arg6[%c0_21, %c0_22] : memref<48x128xf32, #tpu.memory_space<vmem>>, vector<48x128xf32>
    tpu.vector_store %arg6[%c0_21, %c0_22], %161 {strides = array<i32>} : memref<48x128xf32, #tpu.memory_space<vmem>>, vector<48x128xf32>,
    return
  }
  func.func @transform_0(%arg0: i32) -> (i32, i32) {
    %c0_i32 = arith.constant 0 : i32
    %c0_i32_0 = arith.constant 0 : i32
    return %c0_i32, %arg0 : i32, i32
  }
  func.func @transform_1(%arg0: i32) -> (i32, i32) {
    %c0_i32 = arith.constant 0 : i32
    %c0_i32_0 = arith.constant 0 : i32
    %c0_i32_1 = arith.constant 0 : i32
    return %c0_i32, %c0_i32_0 : i32, i32
  }
  func.func @transform_2(%arg0: i32) -> (i32, i32, i32) {
    %c0_i32 = arith.constant 0 : i32
    %c0_i32_0 = arith.constant 0 : i32
    %c0_i32_1 = arith.constant 0 : i32
    %c0_i32_2 = arith.constant 0 : i32
    return %c0_i32, %c0_i32_0, %c0_i32_1 : i32, i32, i32
  }
  func.func @transform_3(%arg0: i32) -> (i32, i32) {
    %c0_i32 = arith.constant 0 : i32
    %c0_i32_0 = arith.constant 0 : i32
    %c0_i32_1 = arith.constant 0 : i32
    return %c0_i32, %c0_i32_0 : i32, i32
  }
  func.func @transform_4(%arg0: i32) -> (i32, i32) {
    %c0_i32 = arith.constant 0 : i32
    %c0_i32_0 = arith.constant 0 : i32
    %c0_i32_1 = arith.constant 0 : i32
    return %c0_i32, %c0_i32_0 : i32, i32
  }
  func.func @transform_5(%arg0: i32) -> (i32, i32) {
    %c0_i32 = arith.constant 0 : i32
    %c0_i32_0 = arith.constant 0 : i32
    return %c0_i32, %arg0 : i32, i32
  }
}

</mosaic_0001>

<bundles_post_ra>
// kernel: tpu_custom_call.1
= control target key start
LH: loop header
LB: loop body
LE: loop exit
PB: predicated region body
PF: predicated region fallthrough
CT: control target
= control target key end

     0   :  { %v23_v0 = vlaneseq  ;;  %v6309_v1 = vmov 0.0   ;;  %s8455_s0 = inlined_call_operand.vmem [shape: s32[16,128], index: 0, kind: input, shape index: {}]   ;;  %s8456_s1 = inlined_call_operand.vmem [shape: f32[48,68], index: 1, kind: input, shape index: {}]   ;;  %s8457_s2 = inlined_call_operand.vmem [shape: f32[5,48,16], index: 2, kind: input, shape index: {}]   ;;  %s8458_s3 = inlined_call_operand.vmem [shape: f32[48,48], index: 3, kind: input, shape index: {}]   ;;  %s8459_s4 = inlined_call_operand.vmem [shape: f32[48,2], index: 4, kind: input, shape index: {}]   ;;  %s8460_s5 = inlined_call_operand.hbm [shape: f32[48,128], index: 5, kind: output, shape index: {}]  }
   0x1   :  { %667 = vmatprep.mubr.f32.mxu0 %v6309_v1  ;;  %762 = vmatprep.mubr.f32.mxu1 %v6309_v1  ;;  %v6353_v3 = vld [vmem:[%s8455_s0] sm:$0xff] }
   0x2   :  { %v6348_v2 = vshrl.u32 %v23_v0, 7 }
   0x3   :  { %10 = vsyncpa [#allocation3], 0  ;;  %v6310_v15 = vmov 1.0|1.0   ;;  %v6572_v33 = vld [vmem:[%s8456_s1] sm:$0xff]  ;;  %v6619_v38 = vld [vmem:[%s8456_s1 + $0x8] sm:$0xff] }
   0x4   :  { %v6356_v4 = vadd.s32 8, %v6348_v2  ;;  %v66_v5 = vsub.s32 1, %v6348_v2  ;;  %v128_v6 = vsub.s32 3, %v6348_v2  ;;  %v35_v7 = vsub.s32 0, %v6348_v2  ;;  %v6664_v42 = vld [vmem:[%s8455_s0 + $0x8] sm:$0xff]  ;;  %v6688_v44 = vld [vmem:[%s8456_s1 + $0x10] sm:$0xff] }
   0x5   :  { %v97_v8 = vsub.s32 2, %v6348_v2  ;;  %v6363_v9 = vadd.s32 16, %v6348_v2  ;;  %v6381_v13 = vadd.s32 24, %v6348_v2  ;;  %v6410_v16 = vadd.s32 32, %v6348_v2  ;;  %v6782_v52 = vld [vmem:[%s8456_s1 + $0x18] sm:$0xff]  ;;  %v6870_v58 = vld [vmem:[%s8456_s1 + $0x20] sm:$0xff] }
   0x6   :  { %v6368_v10 = vrot.slane %v6353_v3, %v66_v5  ;;  %v6373_v11 = vrot.slane %v6353_v3, %v128_v6  ;;  %v6378_v12 = vrot.slane %v6353_v3, %v35_v7  ;;  %v6413_v17 = vadd.s32 40, %v6348_v2 }
   0x7   :  { %v6386_v14 = vrot.slane %v6353_v3, %v97_v8  ;;  %v6431_v18 = vadd.s32 48, %v6348_v2  ;;  %v6434_v19 = vadd.s32 56, %v6348_v2  ;;  %v6447_v20 = vadd.s32 64, %v6348_v2 }
   0x8   :  { %vm68_vm0 = vcmp.eq.s32.totalorder %v6348_v2, %v6368_v10  ;;  %vm69_vm1 = vcmp.eq.s32.totalorder %v6356_v4, %v6368_v10  ;;  %vm130_vm2 = vcmp.eq.s32.totalorder %v6348_v2, %v6373_v11  ;;  %vm131_vm3 = vcmp.eq.s32.totalorder %v6356_v4, %v6373_v11 }
   0x9   :  { %vm5760_vm4 = vmpackc.low %vm69_vm1, %vm68_vm0  ;;  %vm37_vm5 = vcmp.eq.s32.totalorder %v6348_v2, %v6378_v12  ;;  %vm38_vm6 = vcmp.eq.s32.totalorder %v6356_v4, %v6378_v12  ;;  %vm99_vm7 = vcmp.eq.s32.totalorder %v6348_v2, %v6386_v14  ;;  %vm100_vm8 = vcmp.eq.s32.totalorder %v6356_v4, %v6386_v14 }
   0xa   :  { %5761 = vmatprep.subr.msk.bf16.mxu0 %vm5760_vm4, %v6310_v15  ;;  %vm5776_vm9 = vmpackc.low %vm131_vm3, %vm130_vm2  ;;  %vm70_vm10 = vcmp.eq.s32.totalorder %v6363_v9, %v6368_v10  ;;  %vm71_vm11 = vcmp.eq.s32.totalorder %v6381_v13, %v6368_v10  ;;  %vm132_vm13 = vcmp.eq.s32.totalorder %v6363_v9, %v6373_v11  ;;  %vm133_vm14 = vcmp.eq.s32.totalorder %v6381_v13, %v6373_v11 }
   0xb   :  { %5777 = vmatprep.subr.msk.bf16.mxu1 %vm5776_vm9, %v6310_v15  ;;  %vm5762_vm12 = vmpackc.low %vm38_vm6, %vm37_vm5  ;;  %vm39_vm0 = vcmp.eq.s32.totalorder %v6363_v9, %v6378_v12  ;;  %vm40_vm1 = vcmp.eq.s32.totalorder %v6381_v13, %v6378_v12  ;;  %vm101_vm3 = vcmp.eq.s32.totalorder %v6363_v9, %v6386_v14  ;;  %vm102_vm4 = vcmp.eq.s32.totalorder %v6381_v13, %v6386_v14 }
   0xc   :  { %5763 = vmatpush1.bf16.msk.msra.mxu0 %vm5762_vm12, %v6310_v15  ;;  %vm5778_vm15 = vmpackc.low %vm100_vm8, %vm99_vm7  ;;  %vm72_vm6 = vcmp.eq.s32.totalorder %v6410_v16, %v6368_v10  ;;  %vm73_vm7 = vcmp.eq.s32.totalorder %v6413_v17, %v6368_v10  ;;  %vm134_vm9 = vcmp.eq.s32.totalorder %v6410_v16, %v6373_v11  ;;  %vm41_vm12 = vcmp.eq.s32.totalorder %v6410_v16, %v6378_v12 }
   0xd   :  { %5779 = vmatpush1.bf16.msk.msra.mxu1 %vm5778_vm15, %v6310_v15  ;;  %vm5764_vm2 = vmpackc.low %vm71_vm11, %vm70_vm10  ;;  %vm135_vm10 = vcmp.eq.s32.totalorder %v6413_v17, %v6373_v11  ;;  %vm103_vm15 = vcmp.eq.s32.totalorder %v6410_v16, %v6386_v14  ;;  %v190_v21 = vsub.s32 5, %v6348_v2  ;;  %v252_v22 = vsub.s32 7, %v6348_v2 }
   0xe   :  { %5765 = vmatprep.subr.msk.bf16.mxu0 %vm5764_vm2, %v6310_v15  ;;  %vm5780_vm5 = vmpackc.low %vm133_vm14, %vm132_vm13  ;;  %vm42_vm13 = vcmp.eq.s32.totalorder %v6413_v17, %v6378_v12  ;;  %vm75_vm2 = vcmp.eq.s32.totalorder %v6434_v19, %v6368_v10  ;;  %v159_v23 = vsub.s32 4, %v6348_v2  ;;  %v221_v24 = vsub.s32 6, %v6348_v2 }
   0xf   :  { %5781 = vmatprep.subr.msk.bf16.mxu1 %vm5780_vm5, %v6310_v15  ;;  %vm5766_vm8 = vmpackc.low %vm40_vm1, %vm39_vm0  ;;  %vm104_vm0 = vcmp.eq.s32.totalorder %v6413_v17, %v6386_v14  ;;  %vm74_vm1 = vcmp.eq.s32.totalorder %v6431_v18, %v6368_v10  ;;  %vm136_vm5 = vcmp.eq.s32.totalorder %v6431_v18, %v6373_v11  ;;  %v6494_v25 = vrot.slane %v6353_v3, %v190_v21 }
  0x10   :  { %5767 = vmatpush1.bf16.msk.msra.mxu0 %vm5766_vm8, %v6310_v15  ;;  %vm5782_vm11 = vmpackc.low %vm102_vm4, %vm101_vm3  ;;  %vm76_vm8 = vcmp.eq.s32.totalorder %v6447_v20, %v6368_v10  ;;  %v6499_v26 = vrot.slane %v6353_v3, %v252_v22  ;;  %v6515_v27 = vrot.slane %v6353_v3, %v159_v23  ;;  %v6530_v29 = vrot.slane %v6353_v3, %v221_v24 }
  0x11   :  { %5783 = vmatpush1.bf16.msk.msra.mxu1 %vm5782_vm11, %v6310_v15  ;;  %vm5768_vm14 = vmpackc.low %vm73_vm7, %vm72_vm6  ;;  %vm137_vm6 = vcmp.eq.s32.totalorder %v6434_v19, %v6373_v11  ;;  %vm43_vm7 = vcmp.eq.s32.totalorder %v6431_v18, %v6378_v12  ;;  %vm138_vm11 = vcmp.eq.s32.totalorder %v6447_v20, %v6373_v11  ;;  %v5183_v28 = vsel %vm76_vm8, 1.0, %v6309_v1 }
  0x12   :  { %5769 = vmatprep.subr.msk.bf16.mxu0 %vm5768_vm14, %v6310_v15  ;;  %vm5784_vm3 = vmpackc.low %vm135_vm10, %vm134_vm9  ;;  %vm44_vm10 = vcmp.eq.s32.totalorder %v6434_v19, %v6378_v12  ;;  %vm106_vm14 = vcmp.eq.s32.totalorder %v6434_v19, %v6386_v14  ;;  %v5201_v30 = vsel %vm138_vm11, 1.0, %v6309_v1  ;;  %vm255_vm8 = vcmp.eq.s32.totalorder %v6356_v4, %v6499_v26 }
  0x13   :  { %5785 = vmatprep.subr.msk.bf16.mxu1 %vm5784_vm3, %v6310_v15  ;;  %vm5770_vm4 = vmpackc.low %vm42_vm13, %vm41_vm12  ;;  %vm105_vm13 = vcmp.eq.s32.totalorder %v6431_v18, %v6386_v14  ;;  %vm107_vm3 = vcmp.eq.s32.totalorder %v6447_v20, %v6386_v14  ;;  %vm8462_vm11 = vcmask 556032   ;;  %v6725_v47 = vrot.slane %v6664_v42, %v66_v5  ;;  %v6965_v5 = vld [vmem:[%s8456_s1 + $0x28] sm:$0xff] }
  0x14   :  { %5771 = vmatpush1.bf16.msk.msra.mxu0 %vm5770_vm4, %v6310_v15  ;;  %vm5786_vm9 = vmpackc.low %vm104_vm0, %vm103_vm15  ;;  %vm8461_vm0 = vcmask 1043456   ;;  %vm192_vm4 = vcmp.eq.s32.totalorder %v6348_v2, %v6494_v25  ;;  %v5192_v32 = vsel %vm107_vm3, 1.0, %v6309_v1  ;;  %v6750_v49 = vrot.slane %v6664_v42, %v128_v6 }
  0x15   :  { %5787 = vmatpush1.bf16.msk.msra.mxu1 %vm5786_vm9, %v6310_v15  ;;  %vm5772_vm12 = vmpackc.low %vm75_vm2, %vm74_vm1  ;;  %vm45_vm1 = vcmp.eq.s32.totalorder %v6447_v20, %v6378_v12  ;;  %vm161_vm9 = vcmp.eq.s32.totalorder %v6348_v2, %v6515_v27  ;;  %v6774_v51 = vrot.slane %v6664_v42, %v35_v7  ;;  %v6801_v54 = vrot.slane %v6664_v42, %v97_v8 }
  0x16   :  { %5773 = vmatprep.subr.msk.bf16.mxu0 %vm5772_vm12, %v6310_v15  ;;  %vm5788_vm15 = vmpackc.low %vm137_vm6, %vm136_vm5  ;;  %vm193_vm5 = vcmp.eq.s32.totalorder %v6356_v4, %v6494_v25  ;;  %v5174_v31 = vsel %vm45_vm1, 1.0, %v6309_v1  ;;  %vm194_vm1 = vcmp.eq.s32.totalorder %v6363_v9, %v6494_v25  ;;  %v8504_v3 = vmov 0 }
  0x17   :  { %5789 = vmatprep.subr.msk.bf16.mxu1 %vm5788_vm15, %v6310_v15  ;;  %vm5774_vm2 = vmpackc.low %vm44_vm10, %vm43_vm7  ;;  %vm254_vm7 = vcmp.eq.s32.totalorder %v6348_v2, %v6499_v26  ;;  %vm162_vm10 = vcmp.eq.s32.totalorder %v6356_v4, %v6515_v27  ;;  %v8506_v7 = vmov 0  ;;  %v8509_v8 = vmov 0 }
  0x18   :  { %5775 = vmatpush1.bf16.msk.msra.mxu0 %vm5774_vm2, %v6310_v15  ;;  %vm5790_vm6 = vmpackc.low %vm106_vm14, %vm105_vm13  ;;  %vm223_vm13 = vcmp.eq.s32.totalorder %v6348_v2, %v6530_v29  ;;  %vm224_vm14 = vcmp.eq.s32.totalorder %v6356_v4, %v6530_v29  ;;  %vm195_vm2 = vcmp.eq.s32.totalorder %v6381_v13, %v6494_v25  ;;  %v8514_v10 = vmov 0 }
  0x19   :  { %5791 = vmatpush1.bf16.msk.msra.mxu1 %vm5790_vm6, %v6310_v15  ;;  %5326 = vmatprep.subr.msk.mxu0 %vm8461_vm0, %v5183_v28  ;;  %vm6577_vm12 = vmpackc.low %vm193_vm5, %vm192_vm4  ;;  %vm256_vm4 = vcmp.eq.s32.totalorder %v6363_v9, %v6499_v26  ;;  %vm257_vm5 = vcmp.eq.s32.totalorder %v6381_v13, %v6499_v26  ;;  %v7085_v28 = vrot.slane %v6664_v42, %v190_v21  ;;  %v8532_v21 = vmov 0 }
  0x1a   :  { %5350 = vmatprep.subr.msk.mxu1 %vm8461_vm0, %v5201_v30  ;;  %vm6585_vm15 = vmpackc.low %vm255_vm8, %vm254_vm7  ;;  %vm163_vm7 = vcmp.eq.s32.totalorder %v6363_v9, %v6515_v27  ;;  %vm164_vm8 = vcmp.eq.s32.totalorder %v6381_v13, %v6515_v27  ;;  %v8575_v37 = vmov 0  ;;  %v8588_v40 = vmov 0 }
  0x1b   :  { %vm6594_vm3 = vmpackc.low %vm162_vm10, %vm161_vm9  ;;  %vm225_vm10 = vcmp.eq.s32.totalorder %v6363_v9, %v6530_v29  ;;  %v8592_v41 = vmov 0  ;;  %v8598_v43 = vmov 0 }
  0x1c   :  { %5327 = vmatpush1.msk.msra.mxu0 %vm8461_vm0, %v5174_v31  ;;  %vm6605_vm6 = vmpackc.low %vm224_vm14, %vm223_vm13  ;;  %vm226_vm13 = vcmp.eq.s32.totalorder %v6381_v13, %v6530_v29  ;;  %v8546_v31 = vmov 0 }
  0x1d   :  { %5351 = vmatpush1.msk.msra.mxu1 %vm8461_vm0, %v5192_v32  ;;  %5328 = vmatmul.mubr.msk.f32.vlgmr.msra.gmra.mrb[0].mxu0 %vm8462_vm11, %v6572_v33  ;;  %vm6621_vm9 = vmpackc.low %vm195_vm2, %vm194_vm1  ;;  %vm196_vm1 = vcmp.eq.s32.totalorder %v6410_v16, %v6494_v25  ;;  %vm197_vm2 = vcmp.eq.s32.totalorder %v6413_v17, %v6494_v25  ;;  %vm286_vm0 = vcmp.eq.s32.totalorder %v6356_v4, %v6774_v51 }
  0x1e   :  { %5352 = vmatmul.mubr.msk.f32.vlgmr.msra.gmra.mrb[0].mxu1 %vm8462_vm11, %v6572_v33  ;;  %673 = vmatprep.mubr.f32.mxu0 %v6309_v1  ;;  %vm6636_vm14 = vmpackc.low %vm257_vm5, %vm256_vm4  ;;  %vm258_vm4 = vcmp.eq.s32.totalorder %v6410_v16, %v6499_v26  ;;  %vm259_vm5 = vcmp.eq.s32.totalorder %v6413_v17, %v6499_v26 }
  0x1f   :  { %768 = vmatprep.mubr.f32.mxu1 %v6309_v1  ;;  %5793 = vmatprep.subr.msk.bf16.mxu0 %vm6577_vm12, %v6310_v15  ;;  %vm6653_vm12 = vmpackc.low %vm164_vm8, %vm163_vm7  ;;  %vm166_vm7 = vcmp.eq.s32.totalorder %v6413_v17, %v6515_v27  ;;  %vm227_vm8 = vcmp.eq.s32.totalorder %v6410_v16, %v6530_v29 }
  0x20   :  { %5809 = vmatprep.subr.msk.bf16.mxu1 %vm6585_vm15, %v6310_v15  ;;  %5795 = vmatpush1.bf16.msk.msra.mxu0 %vm6594_vm3, %v6310_v15  ;;  %vm6674_vm15 = vmpackc.low %vm226_vm13, %vm225_vm10  ;;  %vm165_vm3 = vcmp.eq.s32.totalorder %v6410_v16, %v6515_v27  ;;  %vm228_vm10 = vcmp.eq.s32.totalorder %v6413_v17, %v6530_v29 }
  0x21   :  { %5329 = vmatmul.mubr.msk.f32.gmra.mrb[2].mxu0 %vm8462_vm11, %v6619_v38  ;;  %5811 = vmatpush1.bf16.msk.msra.mxu1 %vm6605_vm6, %v6310_v15  ;;  %vm6696_vm6 = vmpackc.low %vm197_vm2, %vm196_vm1  ;;  %vm198_vm1 = vcmp.eq.s32.totalorder %v6431_v18, %v6494_v25  ;;  %vm199_vm2 = vcmp.eq.s32.totalorder %v6434_v19, %v6494_v25 }
  0x22   :  { %5353 = vmatmul.mubr.msk.f32.gmra.mrb[2].mxu1 %vm8462_vm11, %v6619_v38  ;;  %679 = vmatprep.mubr.f32.mxu0 %v6309_v1  ;;  %vm6714_vm13 = vmpackc.low %vm259_vm5, %vm258_vm4  ;;  %vm260_vm4 = vcmp.eq.s32.totalorder %v6431_v18, %v6499_v26  ;;  %vm167_vm5 = vcmp.eq.s32.totalorder %v6431_v18, %v6515_v27 }
  0x23   :  { %774 = vmatprep.mubr.f32.mxu1 %v6309_v1  ;;  %5797 = vmatprep.subr.msk.bf16.mxu0 %vm6621_vm9, %v6310_v15  ;;  %vm6739_vm9 = vmpackc.low %vm166_vm7, %vm165_vm3  ;;  %vm168_vm3 = vcmp.eq.s32.totalorder %v6434_v19, %v6515_v27  ;;  %vm229_vm7 = vcmp.eq.s32.totalorder %v6431_v18, %v6530_v29 }
  0x24   :  { %5813 = vmatprep.subr.msk.bf16.mxu1 %vm6636_vm14, %v6310_v15  ;;  %5799 = vmatpush1.bf16.msk.msra.mxu0 %vm6653_vm12, %v6310_v15  ;;  %vm261_vm14 = vcmp.eq.s32.totalorder %v6434_v19, %v6499_v26  ;;  %vm6763_vm12 = vmpackc.low %vm228_vm10, %vm227_vm8  ;;  %vm230_vm8 = vcmp.eq.s32.totalorder %v6434_v19, %v6530_v29 }
  0x25   :  { %5330 = vmatmul.mubr.msk.f32.gmra.mrb[4].mxu0 %vm8462_vm11, %v6688_v44  ;;  %5815 = vmatpush1.bf16.msk.msra.mxu1 %vm6674_vm15, %v6310_v15  ;;  %vm6790_vm15 = vmpackc.low %vm199_vm2, %vm198_vm1  ;;  %vm316_vm1 = vcmp.eq.s32.totalorder %v6348_v2, %v6725_v47  ;;  %vm317_vm2 = vcmp.eq.s32.totalorder %v6356_v4, %v6725_v47 }
  0x26   :  { %5354 = vmatmul.mubr.msk.f32.gmra.mrb[4].mxu1 %vm8462_vm11, %v6688_v44  ;;  %684 = vmatprep.mubr.f32.mxu0 %v6309_v1  ;;  %vm6813_vm10 = vmpackc.low %vm261_vm14, %vm260_vm4  ;;  %vm200_vm4 = vcmp.eq.s32.totalorder %v6447_v20, %v6494_v25  ;;  %vm379_vm14 = vcmp.eq.s32.totalorder %v6356_v4, %v6750_v49  ;;  %v7054_v25 = vrot.slane %v6664_v42, %v252_v22 }
  0x27   :  { %780 = vmatprep.mubr.f32.mxu1 %v6309_v1  ;;  %5801 = vmatprep.subr.msk.bf16.mxu0 %vm6696_vm6, %v6310_v15  ;;  %vm6833_vm6 = vmpackc.low %vm168_vm3, %vm167_vm5  ;;  %vm285_vm3 = vcmp.eq.s32.totalorder %v6348_v2, %v6774_v51  ;;  %vm319_vm5 = vcmp.eq.s32.totalorder %v6381_v13, %v6725_v47  ;;  %v5219_v61 = vsel %vm200_vm4, 1.0, %v6309_v1  ;;  %vm8502_vm4 = vcmp.eq.s32.totalorder %v6447_v20, %v6515_v27 }
  0x28   :  { %5817 = vmatprep.subr.msk.bf16.mxu1 %vm6714_vm13, %v6310_v15  ;;  %5803 = vmatpush1.bf16.msk.msra.mxu0 %vm6739_vm9, %v6310_v15  ;;  %vm378_vm13 = vcmp.eq.s32.totalorder %v6348_v2, %v6750_v49  ;;  %vm6854_vm9 = vmpackc.low %vm230_vm8, %vm229_vm7  ;;  %vm347_vm8 = vcmp.eq.s32.totalorder %v6348_v2, %v6801_v54  ;;  %v5210_v0 = vsel %vm8502_vm4, 1.0, %v6309_v1  ;;  %vm350_vm4 = vcmp.eq.s32.totalorder %v6381_v13, %v6801_v54 }
  0x29   :  { %5331 = vmatmul.mubr.msk.f32.gmra.mrb[6].mxu0 %vm8462_vm11, %v6782_v52  ;;  %5819 = vmatpush1.bf16.msk.msra.mxu1 %vm6763_vm12, %v6310_v15  ;;  %vm6880_vm7 = vmpackc.low %vm317_vm2, %vm316_vm1  ;;  %vm231_vm12 = vcmp.eq.s32.totalorder %v6447_v20, %v6530_v29  ;;  %vm318_vm2 = vcmp.eq.s32.totalorder %v6363_v9, %v6725_v47  ;;  %v7070_v27 = vrot.slane %v6664_v42, %v159_v23 }
  0x2a   :  { %5355 = vmatmul.mubr.msk.f32.gmra.mrb[6].mxu1 %vm8462_vm11, %v6782_v52  ;;  %689 = vmatprep.mubr.f32.mxu0 %v6309_v1  ;;  %vm6900_vm1 = vmpackc.low %vm379_vm14, %vm378_vm13  ;;  %vm8503_vm13 = vcmp.eq.s32.totalorder %v6356_v4, %v6801_v54  ;;  %v5228_v6 = vsel %vm231_vm12, 1.0, %v6309_v1  ;;  %vm320_vm12 = vcmp.eq.s32.totalorder %v6410_v16, %v6725_v47  ;;  %v7090_v23 = vrot.slane %v6664_v42, %v221_v24 }
  0x2b   :  { %786 = vmatprep.mubr.f32.mxu1 %v6309_v1  ;;  %5805 = vmatprep.subr.msk.bf16.mxu0 %vm6790_vm15, %v6310_v15  ;;  %vm6924_vm15 = vmpackc.low %vm286_vm0, %vm285_vm3  ;;  %vm8501_vm0 = vcmp.eq.s32.totalorder %v6447_v20, %v6499_v26 }
  0x2c   :  { %5821 = vmatprep.subr.msk.bf16.mxu1 %vm6813_vm10, %v6310_v15  ;;  %5807 = vmatpush1.bf16.msk.msra.mxu0 %vm6833_vm6, %v6310_v15  ;;  %vm380_vm10 = vcmp.eq.s32.totalorder %v6363_v9, %v6750_v49  ;;  %vm381_vm6 = vcmp.eq.s32.totalorder %v6381_v13, %v6750_v49  ;;  %v5237_v63 = vsel %vm8501_vm0, 1.0, %v6309_v1  ;;  %vm6951_vm14 = vmpackc.low %vm8503_vm13, %vm347_vm8  ;;  %vm349_vm0 = vcmp.eq.s32.totalorder %v6363_v9, %v6801_v54 }
  0x2d   :  { %5332 = vmatmul.mubr.msk.f32.gmra.mrb[8].mxu0 %vm8462_vm11, %v6870_v58  ;;  %5823 = vmatpush1.bf16.msk.msra.mxu1 %vm6854_vm9, %v6310_v15  ;;  %v8505_v3 = vsel %vm6951_vm14, 4294967295, %v8504_v3  ;;  %vm287_vm9 = vcmp.eq.s32.totalorder %v6363_v9, %v6774_v51  ;;  %vm6977_vm8 = vmpackc.low %vm319_vm5, %vm318_vm2  ;;  %vm8508_vm13 = vcmask 1043456   ;;  %vm321_vm2 = vcmp.eq.s32.totalorder %v6413_v17, %v6725_v47 }
  0x2e   :  { %5356 = vmatmul.mubr.msk.f32.gmra.mrb[8].mxu1 %vm8462_vm11, %v6870_v58  ;;  %693 = vmatprep.mubr.f32.mxu0 %v6309_v1  ;;  %v8507_v7 = vsel %vm6977_vm8, 4294967295, %v8506_v7  ;;  %vm6993_vm5 = vmpackc.low %vm381_vm6, %vm380_vm10  ;;  %vm382_vm6 = vcmp.eq.s32.totalorder %v6410_v16, %v6750_v49 }
  0x2f   :  { %792 = vmatprep.mubr.f32.mxu1 %v6309_v1  ;;  %5374 = vmatprep.subr.msk.mxu0 %vm8508_vm13, %v5219_v61  ;;  %v8510_v8 = vsel %vm6993_vm5, 4294967295, %v8509_v8  ;;  %vm8511_vm11 = vmmov %vm8508_vm13  ;;  %vm8513_vm13 = vcmp.eq.s32.totalorder %v6381_v13, %v6774_v51  ;;  %vm383_vm5 = vcmp.eq.s32.totalorder %v6413_v17, %v6750_v49 }
  0x30   :  { %5398 = vmatprep.subr.msk.mxu1 %vm8511_vm11, %v5237_v63  ;;  %vm8512_vm3 = vmmov %vm8511_vm11  ;;  %vm8516_vm11 = vcmask 556032  }
  0x31   :  { %5375 = vmatpush1.msk.msra.mxu0 %vm8512_vm3, %v5210_v0  ;;  %vm7009_vm10 = vmpackc.low %vm8513_vm13, %vm287_vm9  ;;  %5399 = vmatpush1.msk.msra.mxu1 %vm8512_vm3, %v5228_v6  ;;  %vm289_vm9 = vcmp.eq.s32.totalorder %v6410_v16, %v6774_v51  ;;  %vm290_vm13 = vcmp.eq.s32.totalorder %v6413_v17, %v6774_v51 }
  0x32   :  { %v8515_v10 = vsel %vm7009_vm10, 4294967295, %v8514_v10  ;;  %5333 = vmatmul.mubr.msk.f32.gmra.mrb[10].mxu0 %vm8516_vm11, %v6965_v5  ;;  %vm7020_vm8 = vmpackc.low %vm350_vm4, %vm349_vm0  ;;  %vm351_vm0 = vcmp.eq.s32.totalorder %v6410_v16, %v6801_v54  ;;  %vm352_vm4 = vcmp.eq.s32.totalorder %v6413_v17, %v6801_v54  ;;  %5825 = vmatprep.subr.msk.bf16.mxu0 %vm6880_vm7, %v6310_v15 }
  0x33   :  { %vm8519_vm10 = vmmov %vm8516_vm11  ;;  %863 = vmatprep.mubr.f32.mxu0 %v6309_v1  ;;  %5841 = vmatprep.subr.msk.bf16.mxu1 %vm6900_vm1, %v6310_v15  ;;  %vm291_vm1 = vcmp.eq.s32.totalorder %v6431_v18, %v6774_v51 }
  0x34   :  { %5357 = vmatmul.mubr.msk.f32.gmra.mrb[10].mxu1 %vm8519_vm10, %v6965_v5  ;;  %vm7031_vm14 = vmpackc.low %vm321_vm2, %vm320_vm12  ;;  %vm322_vm12 = vcmp.eq.s32.totalorder %v6431_v18, %v6725_v47  ;;  %vm323_vm2 = vcmp.eq.s32.totalorder %v6434_v19, %v6725_v47  ;;  %vm385_vm10 = vcmp.eq.s32.totalorder %v6434_v19, %v6750_v49 }
  0x35   :  { %964 = vmatprep.mubr.f32.mxu1 %v6309_v1  ;;  %vm7043_vm11 = vmpackc.low %vm383_vm5, %vm382_vm6  ;;  %vm384_vm5 = vcmp.eq.s32.totalorder %v6431_v18, %v6750_v49  ;;  %vm8526_vm6 = vcmask 556032  }
  0x36   :  { %vm7059_vm7 = vmpackc.low %vm290_vm13, %vm289_vm9  ;;  %5376 = vmatmul.mubr.msk.f32.vlgmr.msra.gmra.mrb[12].mxu0 %vm8526_vm6, %v6572_v33  ;;  %vm8534_vm9 = vnez %v8505_v3 }
  0x37   :  { %vm7074_vm3 = vmpackc.low %vm352_vm4, %vm351_vm0  ;;  %869 = vmatprep.mubr.f32.mxu0 %v6309_v1  ;;  %vm353_vm4 = vcmp.eq.s32.totalorder %v6431_v18, %v6801_v54  ;;  %5827 = vmatpush1.bf16.msk.msra.mxu0 %vm6924_vm15, %v6310_v15  ;;  %vm8535_vm15 = vnez %v8507_v7 }
  0x38   :  { %vm8529_vm13 = vmmov %vm8526_vm6  ;;  %vm354_vm6 = vcmp.eq.s32.totalorder %v6434_v19, %v6801_v54  ;;  %5829 = vmatprep.subr.msk.bf16.mxu0 %vm8535_vm15, %v6310_v15  ;;  %vm8540_vm15 = vnez %v8510_v8 }
  0x39   :  { %5400 = vmatmul.mubr.msk.f32.vlgmr.msra.gmra.mrb[12].mxu1 %vm8529_vm13, %v6572_v33  ;;  %vm7101_vm0 = vmpackc.low %vm323_vm2, %vm322_vm12 }
  0x3a   :  { %970 = vmatprep.mubr.f32.mxu1 %v6309_v1  ;;  %vm7119_vm12 = vmpackc.low %vm385_vm10, %vm384_vm5  ;;  %5843 = vmatpush1.bf16.msk.msra.mxu1 %vm8534_vm9, %v6310_v15  ;;  %vm8536_vm5 = vcmp.eq.s32.totalorder %v6434_v19, %v6774_v51  ;;  %vm472_vm9 = vcmp.eq.s32.totalorder %v6356_v4, %v7090_v23 }
  0x3b   :  { %v8533_v21 = vsel %vm7119_vm12, 4294967295, %v8532_v21  ;;  %vm7139_vm10 = vmpackc.low %vm8536_vm5, %vm291_vm1  ;;  %5845 = vmatprep.subr.msk.bf16.mxu1 %vm8540_vm15, %v6310_v15  ;;  %vm8549_vm5 = vcmp.eq.s32.totalorder %v6348_v2, %v7070_v27  ;;  %vm8556_vm1 = vcmask 556032  }
  0x3c   :  { %vm8539_vm2 = vmmov %vm8529_vm13 }
  0x3d   :  { %5377 = vmatmul.mubr.msk.f32.gmra.mrb[14].mxu0 %vm8539_vm2, %v6619_v38  ;;  %vm7152_vm12 = vmpackc.low %vm354_vm6, %vm353_vm4  ;;  %vm8544_vm6 = vcmp.eq.s32.totalorder %v6348_v2, %v7054_v25  ;;  %vm8548_vm4 = vnez %v8515_v10 }
  0x3e   :  { %vm8543_vm13 = vmmov %vm8539_vm2  ;;  %875 = vmatprep.mubr.f32.mxu0 %v6309_v1  ;;  %vm8545_vm2 = vcmp.eq.s32.totalorder %v6356_v4, %v7054_v25  ;;  %5831 = vmatpush1.bf16.msk.msra.mxu0 %vm8548_vm4, %v6310_v15 }
  0x3f   :  { %5401 = vmatmul.mubr.msk.f32.gmra.mrb[14].mxu1 %vm8543_vm13, %v6619_v38  ;;  %vm7173_vm15 = vmpackc.low %vm8545_vm2, %vm8544_vm6  ;;  %vm443_vm13 = vcmp.eq.s32.totalorder %v6381_v13, %v7085_v28  ;;  %vm8550_vm6 = vcmp.eq.s32.totalorder %v6356_v4, %v7070_v27  ;;  %5833 = vmatprep.subr.msk.bf16.mxu0 %vm7031_vm14, %v6310_v15  ;;  %vm8557_vm14 = vcmp.eq.s32.totalorder %v6348_v2, %v7085_v28 }
  0x40   :  { %v8547_v31 = vsel %vm7173_vm15, 4294967295, %v8546_v31  ;;  %976 = vmatprep.mubr.f32.mxu1 %v6309_v1  ;;  %vm7191_vm2 = vmpackc.low %vm8550_vm6, %vm8549_vm5  ;;  %5847 = vmatpush1.bf16.msk.msra.mxu1 %vm7020_vm8, %v6310_v15  ;;  %vm8553_vm5 = vcmp.eq.s32.totalorder %v6348_v2, %v7090_v23  ;;  %vm8558_vm8 = vcmp.eq.s32.totalorder %v6356_v4, %v7085_v28  ;;  %v8571_v4 = vmov 0 }
  0x41   :  { %vm7208_vm4 = vmpackc.low %vm472_vm9, %vm8553_vm5  ;;  %5378 = vmatmul.mubr.msk.f32.gmra.mrb[16].mxu0 %vm8556_vm1, %v6688_v44  ;;  %5849 = vmatprep.subr.msk.bf16.mxu1 %vm7043_vm11, %v6310_v15  ;;  %vm8561_vm5 = vcmp.eq.s32.totalorder %v6363_v9, %v7085_v28 }
  0x42   :  { %vm7227_vm9 = vmpackc.low %vm8558_vm8, %vm8557_vm14  ;;  %881 = vmatprep.mubr.f32.mxu0 %v6309_v1  ;;  %vm8566_vm8 = vcmp.eq.s32.totalorder %v6381_v13, %v7054_v25  ;;  %5835 = vmatpush1.bf16.msk.msra.mxu0 %vm7059_vm7, %v6310_v15  ;;  %vm8573_vm7 = vcmp.eq.s32.totalorder %v6363_v9, %v7090_v23 }
  0x43   :  { %vm7234_vm15 = vmpackc.low %vm443_vm13, %vm8561_vm5  ;;  %vm8565_vm13 = vcmp.eq.s32.totalorder %v6363_v9, %v7054_v25  ;;  %5837 = vmatprep.subr.msk.bf16.mxu0 %vm7101_vm0, %v6310_v15  ;;  %vm8578_vm0 = vnez %v8533_v21 }
  0x44   :  { %vm8564_vm6 = vmmov %vm8556_vm1  ;;  %5851 = vmatpush1.bf16.msk.msra.mxu1 %vm7074_vm3, %v6310_v15  ;;  %vm8581_vm3 = vcmp.eq.s32.totalorder %v6413_v17, %v7085_v28 }
  0x45   :  { %5402 = vmatmul.mubr.msk.f32.gmra.mrb[16].mxu1 %vm8564_vm6, %v6688_v44  ;;  %vm7253_vm5 = vmpackc.low %vm8566_vm8, %vm8565_vm13  ;;  %vm8569_vm13 = vcmp.eq.s32.totalorder %v6363_v9, %v7070_v27  ;;  %vm8570_vm8 = vcmp.eq.s32.totalorder %v6381_v13, %v7070_v27  ;;  %5853 = vmatprep.subr.msk.bf16.mxu1 %vm8578_vm0, %v6310_v15 }
  0x46   :  { %982 = vmatprep.mubr.f32.mxu1 %v6309_v1  ;;  %vm7273_vm11 = vmpackc.low %vm8570_vm8, %vm8569_vm13  ;;  %vm8574_vm13 = vcmp.eq.s32.totalorder %v6381_v13, %v7090_v23  ;;  %v8582_v13 = vmov 0  ;;  %5839 = vmatpush1.bf16.msk.msra.mxu0 %vm7139_vm10, %v6310_v15  ;;  %vm8594_vm10 = vcmask 1043456  }
  0x47   :  { %v8572_v4 = vsel %vm7273_vm11, 4294967295, %v8571_v4  ;;  %vm7293_vm8 = vmpackc.low %vm8574_vm13, %vm8573_vm7  ;;  %vm8579_vm7 = vcmp.eq.s32.totalorder %v6447_v20, %v6725_v47  ;;  %vm8585_vm13 = vcmp.eq.s32.totalorder %v6447_v20, %v6750_v49 }
  0x48   :  { %v8576_v37 = vsel %vm7293_vm8, 4294967295, %v8575_v37  ;;  %vm8577_vm6 = vmmov %vm8556_vm1  ;;  %v5255_v9 = vsel %vm8579_vm7, 1.0, %v6309_v1  ;;  %vm8580_vm1 = vcmp.eq.s32.totalorder %v6410_v16, %v7085_v28  ;;  %v5273_v39 = vsel %vm8585_vm13, 1.0, %v6309_v1  ;;  %5855 = vmatpush1.bf16.msk.msra.mxu1 %vm7152_vm12, %v6310_v15 }
  0x49   :  { %5379 = vmatmul.mubr.msk.f32.gmra.mrb[18].mxu0 %vm8577_vm6, %v6782_v52  ;;  %vm7318_vm14 = vmpackc.low %vm8581_vm3, %vm8580_vm1  ;;  %vm8586_vm3 = vcmp.eq.s32.totalorder %v6410_v16, %v7054_v25  ;;  %vm8590_vm13 = vcmp.eq.s32.totalorder %v6410_v16, %v7070_v27  ;;  %5422 = vmatprep.subr.msk.mxu0 %vm8594_vm10, %v5255_v9  ;;  %vm8595_vm1 = vcmp.eq.s32.totalorder %v6447_v20, %v6774_v51 }
  0x4a   :  { %v8583_v13 = vsel %vm7318_vm14, 4294967295, %v8582_v13  ;;  %vm8584_vm7 = vmmov %vm8577_vm6  ;;  %887 = vmatprep.mubr.f32.mxu0 %v6309_v1  ;;  %vm8587_vm6 = vcmp.eq.s32.totalorder %v6413_v17, %v7054_v25  ;;  %v5246_v42 = vsel %vm8595_vm1, 1.0, %v6309_v1  ;;  %vm415_vm12 = vcmp.eq.s32.totalorder %v6431_v18, %v7070_v27 }
  0x4b   :  { %5403 = vmatmul.mubr.msk.f32.gmra.mrb[18].mxu1 %vm8584_vm7, %v6782_v52  ;;  %vm7341_vm0 = vmpackc.low %vm8587_vm6, %vm8586_vm3  ;;  %vm8591_vm6 = vcmp.eq.s32.totalorder %v6413_v17, %v7070_v27  ;;  %vm416_vm10 = vcmp.eq.s32.totalorder %v6434_v19, %v7070_v27  ;;  %vm8600_vm14 = vcmask 556032   ;;  %vm8601_vm1 = vcmask 1043456  }
  0x4c   :  { %v8589_v40 = vsel %vm7341_vm0, 4294967295, %v8588_v40  ;;  %988 = vmatprep.mubr.f32.mxu1 %v6309_v1  ;;  %vm7359_vm3 = vmpackc.low %vm8591_vm6, %vm8590_vm13  ;;  %vm8596_vm13 = vcmp.eq.s32.totalorder %v6410_v16, %v7090_v23  ;;  %vm8597_vm6 = vcmp.eq.s32.totalorder %v6413_v17, %v7090_v23  ;;  %5446 = vmatprep.subr.msk.mxu1 %vm8601_vm1, %v5273_v39  ;;  %v8605_v17 = vmov 0 }
  0x4d   :  { %v8593_v41 = vsel %vm7359_vm3, 4294967295, %v8592_v41  ;;  %vm7381_vm7 = vmpackc.low %vm8597_vm6, %vm8596_vm13  ;;  %5380 = vmatmul.mubr.msk.f32.gmra.mrb[20].mxu0 %vm8600_vm14, %v6870_v58  ;;  %vm8602_vm3 = vcmp.eq.s32.totalorder %v6447_v20, %v6801_v54  ;;  %vm8603_vm13 = vcmp.eq.s32.totalorder %v6431_v18, %v7085_v28  ;;  %vm8604_vm6 = vcmp.eq.s32.totalorder %v6434_v19, %v7085_v28 }
  0x4e   :  { %v8599_v43 = vsel %vm7381_vm7, 4294967295, %v8598_v43  ;;  %v5264_v16 = vsel %vm8602_vm3, 1.0, %v6309_v1  ;;  %vm7402_vm7 = vmpackc.low %vm8604_vm6, %vm8603_vm13  ;;  %vm477_vm14 = vcmp.eq.s32.totalorder %v6431_v18, %v7090_v23  ;;  %vm478_vm1 = vcmp.eq.s32.totalorder %v6434_v19, %v7090_v23  ;;  %893 = vmatprep.mubr.f32.mxu0 %v6309_v1 }
  0x4f   :  { %v8606_v17 = vsel %vm7402_vm7, 4294967295, %v8605_v17  ;;  %vm8607_vm0 = vcmask 556032   ;;  %vm8608_vm3 = vcmp.eq.s32.totalorder %v6431_v18, %v7054_v25  ;;  %vm8609_vm13 = vcmp.eq.s32.totalorder %v6434_v19, %v7054_v25  ;;  %vm7425_vm8 = vmpackc.low %vm416_vm10, %vm415_vm12 }
  0x50   :  { %5404 = vmatmul.mubr.msk.f32.gmra.mrb[20].mxu1 %vm8607_vm0, %v6870_v58  ;;  %vm7419_vm6 = vmpackc.low %vm8609_vm13, %vm8608_vm3  ;;  %vm8612_vm7 = vcmask 1043456   ;;  %vm8618_vm3 = vcmask 556032   ;;  %vm8629_vm13 = vnez %v8589_v40 }
  0x51   :  { %994 = vmatprep.mubr.f32.mxu1 %v6309_v1  ;;  %5423 = vmatpush1.msk.msra.mxu0 %vm8612_vm7, %v5246_v42  ;;  %vm8615_vm0 = vmmov %vm8612_vm7  ;;  %vm8619_vm7 = vnez %v8547_v31 }
  0x52   :  { %5447 = vmatpush1.msk.msra.mxu1 %vm8615_vm0, %v5264_v16  ;;  %5857 = vmatprep.subr.msk.bf16.mxu0 %vm7227_vm9, %v6310_v15  ;;  %vm7433_vm11 = vmpackc.low %vm478_vm1, %vm477_vm14 }
  0x53   :  { %5381 = vmatmul.mubr.msk.f32.gmra.mrb[22].mxu0 %vm8618_vm3, %v6965_v5  ;;  %5873 = vmatprep.subr.msk.bf16.mxu1 %vm8619_vm7, %v6310_v15  ;;  %vm8620_vm12 = vmmov %vm8618_vm3  ;;  %vm8631_vm7 = vnez %v8593_v41 }
  0x54   :  { %5405 = vmatmul.mubr.msk.f32.gmra.mrb[22].mxu1 %vm8620_vm12, %v6965_v5  ;;  %1065 = vmatprep.mubr.f32.mxu0 %v6309_v1  ;;  %vm8621_vm9 = vmmov %vm8618_vm3  ;;  %vm510_vm12 = vcmp.eq.s32.totalorder %v6447_v20, %v7054_v25 }
  0x55   :  { %1166 = vmatprep.mubr.f32.mxu1 %v6309_v1  ;;  %vm8622_vm10 = vmmov %vm8618_vm3  ;;  %v5309_v47 = vsel %vm510_vm12, 1.0, %v6309_v1 }
  0x56   :  { %vm8623_vm14 = vmmov %vm8618_vm3 }
  0x57   :  { %5424 = vmatmul.mubr.msk.f32.vlgmr.msra.gmra.mrb[24].mxu0 %vm8621_vm9, %v6572_v33  ;;  %vm8624_vm1 = vmmov %vm8618_vm3  ;;  %vm448_vm3 = vcmp.eq.s32.totalorder %v6447_v20, %v7085_v28  ;;  %vm8632_vm9 = vnez %v8599_v43 }
  0x58   :  { %5448 = vmatmul.mubr.msk.f32.vlgmr.msra.gmra.mrb[24].mxu1 %vm8622_vm10, %v6572_v33  ;;  %1071 = vmatprep.mubr.f32.mxu0 %v6309_v1  ;;  %vm8630_vm0 = vmmov %vm8624_vm1  ;;  %vm8633_vm10 = vnez %v8606_v17  ;;  %v5291_v19 = vsel %vm448_vm3, 1.0, %v6309_v1 }
  0x59   :  { %1172 = vmatprep.mubr.f32.mxu1 %v6309_v1  ;;  %5859 = vmatpush1.bf16.msk.msra.mxu0 %vm7191_vm2, %v6310_v15  ;;  %vm8625_vm2 = vnez %v8572_v4  ;;  %vm8642_vm3 = vmmov %vm8630_vm0 }
  0x5a   :  { %5875 = vmatpush1.bf16.msk.msra.mxu1 %vm7208_vm4, %v6310_v15  ;;  %5861 = vmatprep.subr.msk.bf16.mxu0 %vm7234_vm15, %v6310_v15  ;;  %vm8626_vm15 = vnez %v8576_v37  ;;  %vm8627_vm4 = vnez %v8583_v13  ;;  %vm8644_vm12 = vmmov %vm8630_vm0 }
  0x5b   :  { %5425 = vmatmul.mubr.msk.f32.gmra.mrb[26].mxu0 %vm8623_vm14, %v6619_v38  ;;  %5877 = vmatprep.subr.msk.bf16.mxu1 %vm7253_vm5, %v6310_v15  ;;  %vm8628_vm5 = vmmov %vm8624_vm1 }
  0x5c   :  { %5449 = vmatmul.mubr.msk.f32.gmra.mrb[26].mxu1 %vm8624_vm1, %v6619_v38  ;;  %1077 = vmatprep.mubr.f32.mxu0 %v6309_v1  ;;  %vm8634_vm14 = vmmov %vm8630_vm0  ;;  %vm417_vm1 = vcmp.eq.s32.totalorder %v6447_v20, %v7070_v27 }
  0x5d   :  { %1178 = vmatprep.mubr.f32.mxu1 %v6309_v1  ;;  %5863 = vmatpush1.bf16.msk.msra.mxu0 %vm8625_vm2, %v6310_v15  ;;  %vm8635_vm2 = vmmov %vm8630_vm0  ;;  %v5282_v48 = vsel %vm417_vm1, 1.0, %v6309_v1 }
  0x5e   :  { %5879 = vmatpush1.bf16.msk.msra.mxu1 %vm8626_vm15, %v6310_v15  ;;  %5865 = vmatprep.subr.msk.bf16.mxu0 %vm8627_vm4, %v6310_v15  ;;  %vm479_vm15 = vcmp.eq.s32.totalorder %v6447_v20, %v7090_v23  ;;  %vm8637_vm4 = vmmov %vm8630_vm0 }
  0x5f   :  { %5426 = vmatmul.mubr.msk.f32.gmra.mrb[28].mxu0 %vm8628_vm5, %v6688_v44  ;;  %5881 = vmatprep.subr.msk.bf16.mxu1 %vm8629_vm13, %v6310_v15  ;;  %v5300_v20 = vsel %vm479_vm15, 1.0, %v6309_v1  ;;  %vm8639_vm13 = vmmov %vm8630_vm0 }
  0x60   :  { %5450 = vmatmul.mubr.msk.f32.gmra.mrb[28].mxu1 %vm8630_vm0, %v6688_v44  ;;  %1083 = vmatprep.mubr.f32.mxu0 %v6309_v1  ;;  %vm8648_vm1 = vmmov %vm8630_vm0 }
  0x61   :  { %1184 = vmatprep.mubr.f32.mxu1 %v6309_v1  ;;  %5867 = vmatpush1.bf16.msk.msra.mxu0 %vm8631_vm7, %v6310_v15  ;;  %vm8643_vm7 = vmmov %vm8630_vm0 }
  0x62   :  { %5883 = vmatpush1.bf16.msk.msra.mxu1 %vm8632_vm9, %v6310_v15  ;;  %5869 = vmatprep.subr.msk.bf16.mxu0 %vm8633_vm10, %v6310_v15  ;;  %vm8645_vm9 = vmmov %vm8630_vm0 }
  0x63   :  { %5427 = vmatmul.mubr.msk.f32.gmra.mrb[30].mxu0 %vm8634_vm14, %v6782_v52  ;;  %5885 = vmatprep.subr.msk.bf16.mxu1 %vm7419_vm6, %v6310_v15  ;;  %vm8636_vm6 = vcmask 1043456   ;;  %vm8646_vm10 = vmmov %vm8630_vm0 }
  0x64   :  { %5451 = vmatmul.mubr.msk.f32.gmra.mrb[30].mxu1 %vm8635_vm2, %v6782_v52  ;;  %1089 = vmatprep.mubr.f32.mxu0 %v6309_v1  ;;  %vm8638_vm5 = vmmov %vm8636_vm6 }
  0x65   :  { %1190 = vmatprep.mubr.f32.mxu1 %v6309_v1  ;;  %5871 = vmatpush1.bf16.msk.msra.mxu0 %vm7425_vm8, %v6310_v15  ;;  %vm8640_vm8 = vmmov %vm8638_vm5 }
  0x66   :  { %5887 = vmatpush1.bf16.msk.msra.mxu1 %vm7433_vm11, %v6310_v15  ;;  %5470 = vmatprep.subr.msk.mxu0 %vm8636_vm6, %v5291_v19  ;;  %vm8641_vm11 = vmmov %vm8638_vm5 }
  0x67   :  { %5428 = vmatmul.mubr.msk.f32.gmra.mrb[32].mxu0 %vm8637_vm4, %v6870_v58  ;;  %5494 = vmatprep.subr.msk.mxu1 %vm8638_vm5, %v5309_v47  ;;  %vm8647_vm14 = vmmov %vm8630_vm0 }
  0x68   :  { %5452 = vmatmul.mubr.msk.f32.gmra.mrb[32].mxu1 %vm8639_vm13, %v6870_v58  ;;  %1095 = vmatprep.mubr.f32.mxu0 %v6309_v1  ;;  %vm8649_vm2 = vmmov %vm8630_vm0 }
  0x69   :  { %1196 = vmatprep.mubr.f32.mxu1 %v6309_v1  ;;  %5471 = vmatpush1.msk.msra.mxu0 %vm8640_vm8, %v5282_v48  ;;  %vm8650_vm15 = vmmov %vm8630_vm0  ;;  %vm1513_vm8 = vcmask 130048  }
  0x6a   :  { %5495 = vmatpush1.msk.msra.mxu1 %vm8641_vm11, %v5300_v20  ;;  %vm8651_vm6 = vmmov %vm8630_vm0  ;;  %vm5018_vm11 = vcmask 392192  }
  0x6b   :  { %5429 = vmatmul.mubr.msk.f32.gmra.mrb[34].mxu0 %vm8630_vm0, %v6965_v5  ;;  %vm8652_vm4 = vmmov %vm8630_vm0 }
  0x6c   :  { %5453 = vmatmul.mubr.msk.f32.gmra.mrb[34].mxu1 %vm8642_vm3, %v6965_v5  ;;  %1267 = vmatprep.mubr.f32.mxu0 %v6309_v1  ;;  %vm8653_vm5 = vmmov %vm8630_vm0 }
  0x6d   :  { %1368 = vmatprep.mubr.f32.mxu1 %v6309_v1  ;;  %vm8654_vm13 = vmmov %vm8630_vm0 }
  0x6f   :  { %5472 = vmatmul.mubr.msk.f32.vlgmr.msra.gmra.mrb[36].mxu0 %vm8643_vm7, %v6572_v33 }
  0x70   :  { %5496 = vmatmul.mubr.msk.f32.vlgmr.msra.gmra.mrb[36].mxu1 %vm8644_vm12, %v6572_v33  ;;  %1273 = vmatprep.mubr.f32.mxu0 %v6309_v1 }
  0x71   :  { %1372 = vmatprep.mubr.f32.mxu1 %v6309_v1 }
  0x73   :  { %5473 = vmatmul.mubr.msk.f32.gmra.mrb[38].mxu0 %vm8645_vm9, %v6619_v38 }
  0x74   :  { %5497 = vmatmul.mubr.msk.f32.gmra.mrb[38].mxu1 %vm8646_vm10, %v6619_v38  ;;  %1279 = vmatprep.mubr.f32.mxu0 %v6309_v1 }
  0x75   :  { %1376 = vmatprep.mubr.f32.mxu1 %v6309_v1 }
  0x77   :  { %5474 = vmatmul.mubr.msk.f32.gmra.mrb[40].mxu0 %vm8647_vm14, %v6688_v44 }
  0x78   :  { %5498 = vmatmul.mubr.msk.f32.gmra.mrb[40].mxu1 %vm8648_vm1, %v6688_v44  ;;  %1285 = vmatprep.mubr.f32.mxu0 %v6309_v1 }
  0x79   :  { %1381 = vmatprep.mubr.f32.mxu1 %v6309_v1 }
  0x7b   :  { %5475 = vmatmul.mubr.msk.f32.gmra.mrb[42].mxu0 %vm8649_vm2, %v6782_v52 }
  0x7c   :  { %5499 = vmatmul.mubr.msk.f32.gmra.mrb[42].mxu1 %vm8650_vm15, %v6782_v52  ;;  %1291 = vmatprep.mubr.f32.mxu0 %v6309_v1 }
  0x7d   :  { %1386 = vmatprep.mubr.f32.mxu1 %v6309_v1 }
  0x7f   :  { %5476 = vmatmul.mubr.msk.f32.gmra.mrb[44].mxu0 %vm8651_vm6, %v6870_v58 }
  0x80   :  { %5500 = vmatmul.mubr.msk.f32.gmra.mrb[44].mxu1 %vm8652_vm4, %v6870_v58  ;;  %1297 = vmatprep.mubr.f32.mxu0 %v6309_v1 }
  0x81   :  { %1392 = vmatprep.mubr.f32.mxu1 %v6309_v1 }
  0x83   :  { %5477 = vmatmul.mubr.msk.f32.gmra.mrb[46].mxu0 %vm8653_vm5, %v6965_v5 }
  0x84   :  { %5501 = vmatmul.mubr.msk.f32.gmra.mrb[46].mxu1 %vm8654_vm13, %v6965_v5  ;;  %1596 = vmatprep.mubr.f32.mxu0 %v6309_v1 }
  0x85   :  { %1626 = vmatprep.mubr.f32.mxu1 %v6309_v1 }
  0xf0   :  { %v669_v15 = vpop.f32.mrb[0].mxu0 }
  0xf1   :  { %v671_v33 = vpop.f32.mrb[1].mxu0  ;;  %v764_v38 = vpop.f32.mrb[0].mxu1 }
  0xf2   :  { %v766_v44 = vpop.f32.mrb[1].mxu1 }
  0xf4   :  { %v675_v49 = vpop.f32.mrb[2].mxu0 }
  0xf5   :  { %v677_v50 = vpop.f32.mrb[3].mxu0  ;;  %v770_v51 = vpop.f32.mrb[2].mxu1 }
  0xf6   :  { %v772_v52 = vpop.f32.mrb[3].mxu1 }
  0xf8   :  { %v681_v53 = vpop.f32.mrb[4].mxu0 }
  0xf9   :  { %v776_v54 = vpop.f32.mrb[4].mxu1  ;;  %v682_v55 = vpop.f32.mrb[5].mxu0 }
  0xfa   :  { %v1400_v56 = vadd.f32 %v776_v54, %v671_v33  ;;  %v1399_v57 = vadd.f32 %v682_v55, %v669_v15  ;;  %v778_v58 = vpop.f32.mrb[5].mxu1 }
  0xfb   :  { %v1401_v59 = vadd.f32 %v778_v58, %v764_v38 }
  0xfc   :  { %v686_v60 = vpop.f32.mrb[6].mxu0 }
  0xfd   :  { %v782_v61 = vpop.f32.mrb[6].mxu1  ;;  %v687_v62 = vpop.f32.mrb[7].mxu0 }
  0xfe   :  { %v1414_v63 = vadd.f32 %v782_v61, %v677_v50  ;;  %v1413_v0 = vadd.f32 %v687_v62, %v675_v49  ;;  %v784_v3 = vpop.f32.mrb[7].mxu1 }
  0xff   :  { %v1415_v5 = vadd.f32 %v784_v3, %v770_v51 }
 0x100   :  { %v691_v6 = vpop.f32.mrb[8].mxu0 }
 0x101   :  { %v788_v7 = vpop.f32.mrb[8].mxu1  ;;  %v692_v8 = vpop.f32.mrb[9].mxu0 }
 0x102   :  { %v1427_v10 = vadd.f32 %v1399_v57, %v788_v7  ;;  %v790_v11 = vpop.f32.mrb[9].mxu1 }
 0x103   :  { %v1428_v12 = vadd.f32 %v1400_v56, %v790_v11 }
 0x104   :  { %v1455_v23 = vmax.f32 %v1427_v10, 0.0 }
 0x105   :  { %v695_v14 = vpop.f32.mrb[10].mxu0  ;;  %v1456_v24 = vmax.f32 %v1428_v12, 0.0 }
 0x106   :  { %v696_v26 = vpop.f32.mrb[11].mxu0 }
 0x107   :  { %v794_v25 = vpop.f32.mrb[10].mxu1 }
 0x108   :  { %v1441_v27 = vadd.f32 %v1413_v0, %v794_v25  ;;  %v796_v22 = vpop.f32.mrb[11].mxu1 }
 0x109   :  { %v1442_v28 = vadd.f32 %v1414_v63, %v796_v22  ;;  %v865_v21 = vpop.f32.mrb[12].mxu0 }
 0x10a   :  { %v1469_v29 = vmax.f32 %v1441_v27, 0.0  ;;  %v867_v31 = vpop.f32.mrb[13].mxu0 }
 0x10b   :  { %v1470_v30 = vmax.f32 %v1442_v28, 0.0 }
 0x10c   :  { %v966_v32 = vpop.f32.mrb[12].mxu1  ;;  %v7576_v34 = vpack.c.bf16 %v1469_v29, %v1455_v23  ;;  %v7605_v23 = vld [vmem:[%s8457_s2 + $0x58] sm:$0xff]  ;;  %v7610_v29 = vld [vmem:[%s8457_s2 + $0x30] sm:$0xff] }
 0x10d   :  { %v7578_v35 = vpop.f32.mrb[13].mxu1  ;;  %v7580_v36 = vpack.c.bf16 %v1470_v30, %v1456_v24 }
 0x110   :  { %v871_v2 = vpop.f32.mrb[14].mxu0 }
 0x111   :  { %v873_v4 = vpop.f32.mrb[15].mxu0 }
 0x112   :  { %v972_v37 = vpop.f32.mrb[14].mxu1 }
 0x113   :  { %v7582_v9 = vpop.f32.mrb[15].mxu1 }
 0x114   :  { %v877_v13 = vpop.f32.mrb[16].mxu0 }
 0x115   :  { %v1402_v39 = vadd.f32 %v877_v13, %v766_v44  ;;  %v879_v41 = vpop.f32.mrb[17].mxu0 }
 0x116   :  { %v1403_v43 = vadd.f32 %v879_v41, %v865_v21 }
 0x118   :  { %v978_v40 = vpop.f32.mrb[16].mxu1 }
 0x119   :  { %v1404_v42 = vadd.f32 %v978_v40, %v867_v31  ;;  %v980_v16 = vpop.f32.mrb[17].mxu1 }
 0x11a   :  { %v7584_v17 = vadd.f32 %v980_v16, %v966_v32  ;;  %v7624_v32 = vld [vmem:[%s8457_s2 + $0x38] sm:$0xff] }
 0x11c   :  { %v883_v45 = vpop.f32.mrb[18].mxu0 }
 0x11d   :  { %v1416_v46 = vadd.f32 %v883_v45, %v772_v52  ;;  %v885_v19 = vpop.f32.mrb[19].mxu0 }
 0x11e   :  { %v984_v18 = vpop.f32.mrb[18].mxu1  ;;  %v1417_v48 = vadd.f32 %v885_v19, %v871_v2 }
 0x11f   :  { %v1418_v47 = vadd.f32 %v984_v18, %v873_v4  ;;  %v986_v20 = vpop.f32.mrb[19].mxu1 }
 0x120   :  { %v7586_v15 = vadd.f32 %v986_v20, %v972_v37  ;;  %v889_v33 = vpop.f32.mrb[20].mxu0 }
 0x121   :  { %v1429_v38 = vadd.f32 %v1401_v59, %v889_v33  ;;  %v891_v44 = vpop.f32.mrb[21].mxu0 }
 0x122   :  { %v1430_v51 = vadd.f32 %v1402_v39, %v891_v44 }
 0x123   :  { %v990_v49 = vpop.f32.mrb[20].mxu1  ;;  %v1457_v62 = vmax.f32 %v1429_v38, 0.0 }
 0x124   :  { %v1431_v50 = vadd.f32 %v1403_v43, %v990_v49  ;;  %v992_v53 = vpop.f32.mrb[21].mxu1  ;;  %v1458_v6 = vmax.f32 %v1430_v51, 0.0 }
 0x125   :  { %v1432_v54 = vadd.f32 %v1404_v42, %v992_v53 }
 0x126   :  { %v895_v55 = vpop.f32.mrb[22].mxu0  ;;  %v1459_v3 = vmax.f32 %v1431_v50, 0.0 }
 0x127   :  { %v1443_v56 = vadd.f32 %v1415_v5, %v895_v55  ;;  %v996_v57 = vpop.f32.mrb[22].mxu1  ;;  %v897_v58 = vpop.f32.mrb[23].mxu0  ;;  %v1460_v10 = vmax.f32 %v1432_v54, 0.0 }
 0x128   :  { %v1445_v52 = vadd.f32 %v1417_v48, %v996_v57  ;;  %v1444_v60 = vadd.f32 %v1416_v46, %v897_v58  ;;  %v998_v61 = vpop.f32.mrb[23].mxu1 }
 0x129   :  { %v1471_v63 = vmax.f32 %v1443_v56, 0.0  ;;  %v1446_v0 = vadd.f32 %v1418_v47, %v998_v61 }
 0x12a   :  { %v1473_v7 = vmax.f32 %v1445_v52, 0.0  ;;  %v1472_v59 = vmax.f32 %v1444_v60, 0.0  ;;  %v1067_v8 = vpop.f32.mrb[24].mxu0 }
 0x12b   :  { %v7588_v11 = vpack.c.bf16 %v1471_v63, %v1457_v62  ;;  %v1474_v12 = vmax.f32 %v1446_v0, 0.0  ;;  %v1069_v14 = vpop.f32.mrb[25].mxu0  ;;  %v1168_v25 = vpop.f32.mrb[24].mxu1 }
 0x12c   :  { %v7590_v5 = vpack.c.bf16 %v1473_v7, %v1459_v3  ;;  %v7592_v26 = vpack.c.bf16 %v1472_v59, %v1458_v6  ;;  %v7594_v27 = vpop.f32.mrb[25].mxu1 }
 0x12d   :  { %v7596_v22 = vpack.c.bf16 %v1474_v12, %v1460_v10  ;;  %5889 = vmatprep.subr.bf16.mxu0 %v7588_v11  ;;  %6016 = vmatprep.subr.bf16.mxu1 %v7588_v11 }
 0x12e   :  { %v1073_v28 = vpop.f32.mrb[26].mxu0  ;;  %5891 = vmatpush1.bf16.msra.mxu0 %v7580_v36  ;;  %6017 = vmatpush1.bf16.msra.mxu1 %v7580_v36 }
 0x12f   :  { %v1075_v21 = vpop.f32.mrb[27].mxu0  ;;  %5893 = vmatprep.subr.bf16.mxu1 %v7590_v5  ;;  %v1174_v24 = vpop.f32.mrb[26].mxu1 }
 0x130   :  { %v7613_v30 = vpop.f32.mrb[27].mxu1 }
 0x131   :  { %5507 = vmatmul.mubr.msk.f32.vlgmr.msra.gmra.mrb[48].mxu1 %vm1513_vm8, %v7605_v23  ;;  %5502 = vmatmul.mubr.msk.f32.vlgmr.msra.gmra.mrb[48].mxu0 %vm1513_vm8, %v7610_v29 }
 0x132   :  { %v1079_v31 = vpop.f32.mrb[28].mxu0  ;;  %5895 = vmatpush1.bf16.msra.mxu1 %v7592_v26  ;;  %1697 = vmatprep.mubr.f32.mxu1 %v6309_v1 }
 0x133   :  { %v1406_v2 = vadd.f32 %v1079_v31, %v7578_v35  ;;  %v1180_v4 = vpop.f32.mrb[28].mxu1  ;;  %v1081_v37 = vpop.f32.mrb[29].mxu0  ;;  %1602 = vmatprep.mubr.f32.mxu0 %v6309_v1  ;;  %v7639_v35 = vld [vmem:[%s8457_s2 + $0x40] sm:$0xff] }
 0x134   :  { %v1408_v13 = vadd.f32 %v1180_v4, %v1069_v14  ;;  %v1407_v39 = vadd.f32 %v1081_v37, %v1067_v8  ;;  %v1182_v40 = vpop.f32.mrb[29].mxu1 }
 0x135   :  { %v7628_v41 = vadd.f32 %v1182_v40, %v1168_v25  ;;  %5508 = vmatmul.mubr.msk.f32.vlgmr.msra.gmra.mrb[50].mxu1 %vm1513_vm8, %v7610_v29  ;;  %5503 = vmatmul.mubr.msk.f32.gmra.mrb[50].mxu0 %vm1513_vm8, %v7624_v32 }
 0x136   :  { %v1085_v42 = vpop.f32.mrb[30].mxu0  ;;  %1703 = vmatprep.mubr.f32.mxu1 %v6309_v1  ;;  %1608 = vmatprep.mubr.f32.mxu0 %v6309_v1 }
 0x137   :  { %v1420_v43 = vadd.f32 %v1085_v42, %v7582_v9  ;;  %v1186_v16 = vpop.f32.mrb[30].mxu1  ;;  %v1087_v45 = vpop.f32.mrb[31].mxu0  ;;  %v7653_v9 = vld [vmem:[%s8457_s2 + $0x48] sm:$0xff] }
 0x138   :  { %v1422_v46 = vadd.f32 %v1186_v16, %v1075_v21  ;;  %v1421_v18 = vadd.f32 %v1087_v45, %v1073_v28  ;;  %v1188_v19 = vpop.f32.mrb[31].mxu1 }
 0x139   :  { %v7642_v47 = vadd.f32 %v1188_v19, %v1174_v24  ;;  %5509 = vmatmul.mubr.msk.f32.gmra.mrb[52].mxu1 %vm1513_vm8, %v7624_v32  ;;  %5504 = vmatmul.mubr.msk.f32.gmra.mrb[52].mxu0 %vm1513_vm8, %v7639_v35 }
 0x13a   :  { %v1091_v48 = vpop.f32.mrb[32].mxu0  ;;  %1709 = vmatprep.mubr.f32.mxu1 %v6309_v1  ;;  %1614 = vmatprep.mubr.f32.mxu0 %v6309_v1 }
 0x13b   :  { %v1433_v20 = vadd.f32 %v7584_v17, %v1091_v48  ;;  %v1192_v33 = vpop.f32.mrb[32].mxu1  ;;  %v1093_v38 = vpop.f32.mrb[33].mxu0  ;;  %v7665_v17 = vld [vmem:[%s8457_s2 + $0x50] sm:$0xff] }
 0x13c   :  { %v1435_v49 = vadd.f32 %v1407_v39, %v1192_v33  ;;  %v1434_v44 = vadd.f32 %v1406_v2, %v1093_v38  ;;  %v1194_v50 = vpop.f32.mrb[33].mxu1 }
 0x13d   :  { %v1436_v51 = vadd.f32 %v1408_v13, %v1194_v50  ;;  %5510 = vmatmul.mubr.msk.f32.gmra.mrb[54].mxu1 %vm1513_vm8, %v7639_v35  ;;  %5505 = vmatmul.mubr.msk.f32.gmra.mrb[54].mxu0 %vm1513_vm8, %v7653_v9  ;;  %v1461_v60 = vmax.f32 %v1433_v20, 0.0 }
 0x13e   :  { %v1097_v53 = vpop.f32.mrb[34].mxu0  ;;  %1715 = vmatprep.mubr.f32.mxu1 %v6309_v1  ;;  %1620 = vmatprep.mubr.f32.mxu0 %v6309_v1  ;;  %v1463_v63 = vmax.f32 %v1435_v49, 0.0  ;;  %v1462_v0 = vmax.f32 %v1434_v44, 0.0 }
 0x13f   :  { %v1447_v54 = vadd.f32 %v7586_v15, %v1097_v53  ;;  %v1198_v55 = vpop.f32.mrb[34].mxu1  ;;  %v1099_v56 = vpop.f32.mrb[35].mxu0  ;;  %v1464_v15 = vmax.f32 %v1436_v51, 0.0 }
 0x140   :  { %v1449_v57 = vadd.f32 %v1421_v18, %v1198_v55  ;;  %v1448_v58 = vadd.f32 %v1420_v43, %v1099_v56  ;;  %v1200_v52 = vpop.f32.mrb[35].mxu1 }
 0x141   :  { %v1475_v61 = vmax.f32 %v1447_v54, 0.0  ;;  %v1450_v62 = vadd.f32 %v1422_v46, %v1200_v52  ;;  %5511 = vmatmul.mubr.msk.f32.gmra.mrb[56].mxu1 %vm1513_vm8, %v7653_v9  ;;  %5506 = vmatmul.mubr.msk.f32.gmra.mrb[56].mxu0 %vm1513_vm8, %v7665_v17 }
 0x142   :  { %v1477_v3 = vmax.f32 %v1449_v57, 0.0  ;;  %v1476_v6 = vmax.f32 %v1448_v58, 0.0  ;;  %v1269_v7 = vpop.f32.mrb[36].mxu0  ;;  %1721 = vmatprep.mubr.f32.mxu1 %v6309_v1  ;;  %1798 = vmatprep.mubr.f32.mxu0 %v6309_v1 }
 0x143   :  { %v7674_v59 = vpack.c.bf16 %v1475_v61, %v1461_v60  ;;  %v1478_v8 = vmax.f32 %v1450_v62, 0.0  ;;  %v1271_v10 = vpop.f32.mrb[37].mxu0  ;;  %v1370_v12 = vpop.f32.mrb[36].mxu1 }
 0x144   :  { %v7676_v14 = vpack.c.bf16 %v1477_v3, %v1463_v63  ;;  %v7678_v25 = vpack.c.bf16 %v1476_v6, %v1462_v0  ;;  %v1371_v28 = vpop.f32.mrb[37].mxu1 }
 0x145   :  { %v7680_v21 = vpack.c.bf16 %v1478_v8, %v1464_v15  ;;  %5512 = vmatmul.mubr.msk.f32.gmra.mrb[58].mxu1 %vm1513_vm8, %v7665_v17  ;;  %5897 = vmatprep.subr.bf16.mxu0 %v7674_v59  ;;  %v7965_v28 = vld [vmem:[%s8457_s2 + $0x78] sm:$0xff] }
 0x146   :  { %5901 = vmatprep.subr.bf16.mxu1 %v7676_v14  ;;  %v1275_v24 = vpop.f32.mrb[38].mxu0  ;;  %5899 = vmatpush1.bf16.msra.mxu0 %v7596_v22 }
 0x147   :  { %5903 = vmatpush1.bf16.msra.mxu1 %v7678_v25  ;;  %v1277_v31 = vpop.f32.mrb[39].mxu0  ;;  %v1374_v2 = vpop.f32.mrb[38].mxu1  ;;  %1727 = vmatprep.mubr.f32.mxu1 %v6309_v1 }
 0x148   :  { %v1375_v4 = vpop.f32.mrb[39].mxu1 }
 0x149   :  { %5513 = vmatmul.mubr.msk.f32.gmra.mrb[60].mxu1 %vm1513_vm8, %v7605_v23  ;;  %5514 = vmatmul.mubr.msk.f32.vlgmr.msra.gmra.mrb[58].mxu0 %vm1513_vm8, %v7610_v29  ;;  %v8082_v4 = vld [vmem:[%s8457_s2 + $0x90] sm:$0xff] }
 0x14a   :  { %v1281_v37 = vpop.f32.mrb[40].mxu0  ;;  %1804 = vmatprep.mubr.f32.mxu0 %v6309_v1  ;;  %1899 = vmatprep.mubr.f32.mxu1 %v6309_v1 }
 0x14b   :  { %v1410_v13 = vadd.f32 %v1281_v37, %v7594_v27  ;;  %v1378_v39 = vpop.f32.mrb[40].mxu1  ;;  %v1283_v40 = vpop.f32.mrb[41].mxu0  ;;  %v8093_v37 = vld [vmem:[%s8457_s2 + $0x98] sm:$0xff] }
 0x14c   :  { %v1412_v42 = vadd.f32 %v1378_v39, %v1271_v10  ;;  %v1411_v43 = vadd.f32 %v1283_v40, %v1269_v7  ;;  %v1380_v16 = vpop.f32.mrb[41].mxu1  ;;  %v1504_v39 = vld [vmem:[%s8457_s2 + $0xa8] sm:$0xff]  ;;  %v1505_v40 = vld [vmem:[%s8457_s2 + $0xb0] sm:$0xff] }
 0x14d   :  { %5515 = vmatmul.mubr.msk.f32.gmra.mrb[60].mxu0 %vm1513_vm8, %v7624_v32  ;;  %5520 = vmatmul.mubr.msk.f32.vlgmr.msra.gmra.mrb[62].mxu1 %vm1513_vm8, %v7610_v29  ;;  %v8223_v16 = vld [vmem:[%s8457_s2 + $0xd0] sm:$0xff] }
 0x14e   :  { %v1287_v45 = vpop.f32.mrb[42].mxu0  ;;  %1810 = vmatprep.mubr.f32.mxu0 %v6309_v1  ;;  %1905 = vmatprep.mubr.f32.mxu1 %v6309_v1 }
 0x14f   :  { %v1424_v46 = vadd.f32 %v1287_v45, %v7613_v30  ;;  %v1383_v18 = vpop.f32.mrb[42].mxu1  ;;  %v1289_v27 = vpop.f32.mrb[43].mxu0  ;;  %v8234_v45 = vld [vmem:[%s8457_s2 + $0xd8] sm:$0xff] }
 0x150   :  { %v1426_v19 = vadd.f32 %v1383_v18, %v1277_v31  ;;  %v1425_v48 = vadd.f32 %v1289_v27, %v1275_v24  ;;  %v1385_v20 = vpop.f32.mrb[43].mxu1  ;;  %v7976_v24 = vld [vmem:[%s8457_s2 + $0x80] sm:$0xff]  ;;  %v7987_v31 = vld [vmem:[%s8457_s2 + $0x88] sm:$0xff]  ;;  %v6311_v27 = vmov 0  }
 0x151   :  { %5516 = vmatmul.mubr.msk.f32.gmra.mrb[62].mxu0 %vm1513_vm8, %v7639_v35  ;;  %5521 = vmatmul.mubr.msk.f32.gmra.mrb[64].mxu1 %vm1513_vm8, %v7624_v32  ;;  %v8257_v18 = vld [vmem:[%s8457_s2 + $0xe0] sm:$0xff]  ;;  %v1512_v20 = vld [vmem:[%s8457_s2 + $0xe8] sm:$0xff] }
 0x152   :  { %v1293_v33 = vpop.f32.mrb[44].mxu0  ;;  %1816 = vmatprep.mubr.f32.mxu0 %v6309_v1  ;;  %1911 = vmatprep.mubr.f32.mxu1 %v6309_v1 }
 0x153   :  { %v1437_v38 = vadd.f32 %v7628_v41, %v1293_v33  ;;  %v1388_v49 = vpop.f32.mrb[44].mxu1  ;;  %v1295_v30 = vpop.f32.mrb[45].mxu0  ;;  %6281 = vset.pattern.permute.xlu0 %v6311_v27  ;;  %6282 = vset.pattern.permute.xlu1 %v6311_v27  ;;  %v8288_v33 = vld [vmem:[%s8459_s4 + $0x20] sm:$0xff] }
 0x154   :  { %v1439_v44 = vadd.f32 %v1411_v43, %v1388_v49  ;;  %v1438_v50 = vadd.f32 %v1410_v13, %v1295_v30  ;;  %v1390_v51 = vpop.f32.mrb[45].mxu1  ;;  %v1503_v13 = vld [vmem:[%s8457_s2 + $0xa0] sm:$0xff] }
 0x155   :  { %v1440_v53 = vadd.f32 %v1412_v42, %v1390_v51  ;;  %5517 = vmatmul.mubr.msk.f32.gmra.mrb[64].mxu0 %vm1513_vm8, %v7653_v9  ;;  %5522 = vmatmul.mubr.msk.f32.gmra.mrb[66].mxu1 %vm1513_vm8, %v7639_v35  ;;  %v1465_v60 = vmax.f32 %v1437_v38, 0.0  ;;  %v8130_v42 = vld [vmem:[%s8457_s2 + $0xb8] sm:$0xff]  ;;  %v8293_v38 = vld [vmem:[%s8459_s4 + $0x28] sm:$0xff] }
 0x156   :  { %v1299_v54 = vpop.f32.mrb[46].mxu0  ;;  %1822 = vmatprep.mubr.f32.mxu0 %v6309_v1  ;;  %1917 = vmatprep.mubr.f32.mxu1 %v6309_v1  ;;  %v1467_v63 = vmax.f32 %v1439_v44, 0.0  ;;  %v1466_v0 = vmax.f32 %v1438_v50, 0.0 }
 0x157   :  { %v1451_v55 = vadd.f32 %v7642_v47, %v1299_v54  ;;  %v1394_v41 = vpop.f32.mrb[46].mxu1  ;;  %v1301_v56 = vpop.f32.mrb[47].mxu0  ;;  %v1468_v47 = vmax.f32 %v1440_v53, 0.0 }
 0x158   :  { %v1453_v57 = vadd.f32 %v1425_v48, %v1394_v41  ;;  %v1452_v58 = vadd.f32 %v1424_v46, %v1301_v56  ;;  %v1396_v52 = vpop.f32.mrb[47].mxu1  ;;  %v8250_v46 = vld [vmem:[%s8459_s4 + $0x10] sm:$0xff]  ;;  %v8273_v48 = vld [vmem:[%s8459_s4 + $0x18] sm:$0xff] }
 0x159   :  { %v1479_v61 = vmax.f32 %v1451_v55, 0.0  ;;  %v1454_v62 = vadd.f32 %v1426_v19, %v1396_v52  ;;  %5518 = vmatmul.mubr.msk.f32.gmra.mrb[66].mxu0 %vm1513_vm8, %v7665_v17  ;;  %5523 = vmatmul.mubr.msk.f32.gmra.mrb[68].mxu1 %vm1513_vm8, %v7653_v9  ;;  %v8268_v19 = vld [vmem:[%s8459_s4 + $0x8] sm:$0xff] }
 0x15a   :  { %v1481_v3 = vmax.f32 %v1453_v57, 0.0  ;;  %v1480_v6 = vmax.f32 %v1452_v58, 0.0  ;;  %1828 = vmatprep.mubr.f32.mxu0 %v6309_v1  ;;  %1923 = vmatprep.mubr.f32.mxu1 %v6309_v1 }
 0x15b   :  { %v7723_v7 = vpack.c.bf16 %v1479_v61, %v1465_v60  ;;  %v1482_v15 = vmax.f32 %v1454_v62, 0.0  ;;  %4958 = vperm.xlu1 %6282, %v8250_v46  }
 0x15c   :  { %v7725_v8 = vpack.c.bf16 %v1481_v3, %v1467_v63  ;;  %v7727_v10 = vpack.c.bf16 %v1480_v6, %v1466_v0  ;;  %v6312_v63 = vmov 1  }
 0x15d   :  { %v7729_v12 = vpack.c.bf16 %v1482_v15, %v1468_v47  ;;  %5519 = vmatmul.mubr.msk.f32.gmra.mrb[68].mxu0 %vm1513_vm8, %v7605_v23  ;;  %5524 = vmatmul.mubr.msk.f32.gmra.mrb[70].mxu1 %vm1513_vm8, %v7665_v17 }
 0x15e   :  { %5905 = vmatprep.subr.bf16.mxu0 %v7723_v7  ;;  %5909 = vmatprep.subr.bf16.mxu1 %v7725_v8 }
 0x15f   :  { %5907 = vmatpush1.bf16.msra.mxu0 %v7680_v21  ;;  %5911 = vmatpush1.bf16.msra.mxu1 %v7727_v10 }
 0x160   :  { %5913 = vmatprep.subr.bf16.mxu0 %v7580_v36  ;;  %5917 = vmatprep.subr.bf16.mxu1 %v7592_v26  ;;  %v7797_v36 = vld [vmem:[%s8457_s2 + $0x8] sm:$0xff] }
 0x161   :  { %1929 = vmatprep.mubr.f32.mxu1 %v6309_v1  ;;  %2000 = vmatprep.mubr.f32.mxu0 %v6309_v1 }
 0x162   :  { %5525 = vmatmul.mubr.msk.f32.gmra.mrb[72].mxu1 %vm1513_vm8, %v7605_v23  ;;  %5526 = vmatmul.mubr.msk.f32.vlgmr.msra.gmra.mrb[70].mxu0 %vm1513_vm8, %v7610_v29 }
 0x163   :  { %5915 = vmatpush1.bf16.msra.mxu0 %v7576_v34  ;;  %2006 = vmatprep.mubr.f32.mxu0 %v6309_v1  ;;  %v7786_v34 = vld [vmem:[%s8457_s2] sm:$0xff] }
 0x164   :  { %5921 = vmatprep.subr.bf16.mxu0 %v7596_v22  ;;  %2101 = vmatprep.mubr.f32.mxu1 %v6309_v1 }
 0x165   :  { %4963 = vperm.xlu1 %6282, %v8273_v48  }
 0x166   :  { %5527 = vmatmul.mubr.msk.f32.gmra.mrb[72].mxu0 %vm1513_vm8, %v7624_v32  ;;  %5532 = vmatmul.mubr.msk.f32.vlgmr.msra.gmra.mrb[74].mxu1 %vm1513_vm8, %v7610_v29  ;;  %v7823_v29 = vld [vmem:[%s8457_s2 + $0x18] sm:$0xff] }
 0x167   :  { %5919 = vmatpush1.bf16.msra.mxu1 %v7588_v11  ;;  %2012 = vmatprep.mubr.f32.mxu0 %v6309_v1 }
 0x168   :  { %5925 = vmatprep.subr.bf16.mxu1 %v7678_v25  ;;  %2107 = vmatprep.mubr.f32.mxu1 %v6309_v1 }
 0x169   :  { %4973 = vperm.xlu1 %6282, %v8293_v38  }
 0x16a   :  { %5528 = vmatmul.mubr.msk.f32.gmra.mrb[74].mxu0 %vm1513_vm8, %v7639_v35  ;;  %5533 = vmatmul.mubr.msk.f32.gmra.mrb[76].mxu1 %vm1513_vm8, %v7624_v32  ;;  %v7834_v32 = vld [vmem:[%s8457_s2 + $0x20] sm:$0xff] }
 0x16b   :  { %2018 = vmatprep.mubr.f32.mxu0 %v6309_v1  ;;  %2113 = vmatprep.mubr.f32.mxu1 %v6309_v1 }
 0x16d   :  { %6284 = vset.pattern.permute.xlu1 %v6312_v63 }
 0x16e   :  { %5529 = vmatmul.mubr.msk.f32.gmra.mrb[76].mxu0 %vm1513_vm8, %v7653_v9  ;;  %5534 = vmatmul.mubr.msk.f32.gmra.mrb[78].mxu1 %vm1513_vm8, %v7639_v35  ;;  %v1488_v35 = vld [vmem:[%s8457_s2 + $0x28] sm:$0xff] }
 0x16f   :  { %2024 = vmatprep.mubr.f32.mxu0 %v6309_v1  ;;  %2119 = vmatprep.mubr.f32.mxu1 %v6309_v1 }
 0x170   :  { %4999 = vperm.xlu1 %6284, %v8268_v19  }
 0x172   :  { %5530 = vmatmul.mubr.msk.f32.gmra.mrb[78].mxu0 %vm1513_vm8, %v7665_v17  ;;  %5535 = vmatmul.mubr.msk.f32.gmra.mrb[80].mxu1 %vm1513_vm8, %v7653_v9  ;;  %v7939_v9 = vld [vmem:[%s8457_s2 + $0x68] sm:$0xff] }
 0x173   :  { %2030 = vmatprep.mubr.f32.mxu0 %v6309_v1  ;;  %2125 = vmatprep.mubr.f32.mxu1 %v6309_v1 }
 0x174   :  { %5003 = vperm.xlu1 %6284, %v8250_v46  }
 0x176   :  { %5531 = vmatmul.mubr.msk.f32.gmra.mrb[80].mxu0 %vm1513_vm8, %v7605_v23  ;;  %5536 = vmatmul.mubr.msk.f32.gmra.mrb[82].mxu1 %vm1513_vm8, %v7665_v17  ;;  %v7952_v17 = vld [vmem:[%s8457_s2 + $0x70] sm:$0xff] }
 0x177   :  { %2131 = vmatprep.mubr.f32.mxu1 %v6309_v1  ;;  %2220 = vmatprep.mubr.f32.mxu0 %v6309_v1 }
 0x178   :  { %5011 = vperm.xlu1 %6284, %v8288_v33  }
 0x17a   :  { %5537 = vmatmul.mubr.msk.f32.gmra.mrb[84].mxu1 %vm1513_vm8, %v7605_v23  ;;  %5538 = vmatmul.mubr.msk.f32.vlgmr.msra.gmra.mrb[48].mxu0 %vm1513_vm8, %v7786_v34  ;;  %v7810_v23 = vld [vmem:[%s8457_s2 + $0x10] sm:$0xff] }
 0x17b   :  { %5923 = vmatpush1.bf16.msra.mxu0 %v7590_v5  ;;  %2226 = vmatprep.mubr.f32.mxu0 %v6309_v1 }
 0x17c   :  { %5929 = vmatprep.subr.bf16.mxu0 %v7680_v21  ;;  %2321 = vmatprep.mubr.f32.mxu1 %v6309_v1 }
 0x17e   :  { %5539 = vmatmul.mubr.msk.f32.gmra.mrb[50].mxu0 %vm1513_vm8, %v7797_v36  ;;  %5544 = vmatmul.mubr.msk.f32.vlgmr.msra.gmra.mrb[50].mxu1 %vm1513_vm8, %v7786_v34 }
 0x17f   :  { %5927 = vmatpush1.bf16.msra.mxu1 %v7674_v59  ;;  %2232 = vmatprep.mubr.f32.mxu0 %v6309_v1 }
 0x180   :  { %5933 = vmatprep.subr.bf16.mxu1 %v7727_v10  ;;  %2327 = vmatprep.mubr.f32.mxu1 %v6309_v1 }
 0x182   :  { %5540 = vmatmul.mubr.msk.f32.gmra.mrb[52].mxu0 %vm1513_vm8, %v7810_v23  ;;  %5545 = vmatmul.mubr.msk.f32.gmra.mrb[52].mxu1 %vm1513_vm8, %v7797_v36 }
 0x183   :  { %2238 = vmatprep.mubr.f32.mxu0 %v6309_v1  ;;  %2333 = vmatprep.mubr.f32.mxu1 %v6309_v1 }
 0x186   :  { %5541 = vmatmul.mubr.msk.f32.gmra.mrb[54].mxu0 %vm1513_vm8, %v7823_v29  ;;  %5546 = vmatmul.mubr.msk.f32.gmra.mrb[54].mxu1 %vm1513_vm8, %v7810_v23 }
 0x187   :  { %2244 = vmatprep.mubr.f32.mxu0 %v6309_v1  ;;  %2339 = vmatprep.mubr.f32.mxu1 %v6309_v1 }
 0x18a   :  { %5542 = vmatmul.mubr.msk.f32.gmra.mrb[56].mxu0 %vm1513_vm8, %v7834_v32  ;;  %5547 = vmatmul.mubr.msk.f32.gmra.mrb[56].mxu1 %vm1513_vm8, %v7823_v29 }
 0x18b   :  { %2250 = vmatprep.mubr.f32.mxu0 %v6309_v1  ;;  %2345 = vmatprep.mubr.f32.mxu1 %v6309_v1 }
 0x18e   :  { %5543 = vmatmul.mubr.msk.f32.gmra.mrb[82].mxu0 %vm1513_vm8, %v1488_v35  ;;  %5548 = vmatmul.mubr.msk.f32.gmra.mrb[58].mxu1 %vm1513_vm8, %v7834_v32 }
 0x18f   :  { %2351 = vmatprep.mubr.f32.mxu1 %v6309_v1  ;;  %2422 = vmatprep.mubr.f32.mxu0 %v6309_v1 }
 0x192   :  { %5549 = vmatmul.mubr.msk.f32.gmra.mrb[60].mxu1 %vm1513_vm8, %v1488_v35  ;;  %5550 = vmatmul.mubr.msk.f32.vlgmr.msra.gmra.mrb[58].mxu0 %vm1513_vm8, %v7786_v34 }
 0x193   :  { %5931 = vmatpush1.bf16.msra.mxu0 %v7676_v14  ;;  %2428 = vmatprep.mubr.f32.mxu0 %v6309_v1 }
 0x194   :  { %5937 = vmatprep.subr.bf16.mxu0 %v7592_v26  ;;  %2523 = vmatprep.mubr.f32.mxu1 %v6309_v1 }
 0x196   :  { %5551 = vmatmul.mubr.msk.f32.gmra.mrb[60].mxu0 %vm1513_vm8, %v7797_v36  ;;  %5556 = vmatmul.mubr.msk.f32.vlgmr.msra.gmra.mrb[62].mxu1 %vm1513_vm8, %v7786_v34 }
 0x197   :  { %5935 = vmatpush1.bf16.msra.mxu1 %v7723_v7  ;;  %2434 = vmatprep.mubr.f32.mxu0 %v6309_v1 }
 0x198   :  { %5941 = vmatprep.subr.bf16.mxu1 %v7596_v22  ;;  %2529 = vmatprep.mubr.f32.mxu1 %v6309_v1 }
 0x19a   :  { %5552 = vmatmul.mubr.msk.f32.gmra.mrb[62].mxu0 %vm1513_vm8, %v7810_v23  ;;  %5557 = vmatmul.mubr.msk.f32.gmra.mrb[64].mxu1 %vm1513_vm8, %v7797_v36 }
 0x19b   :  { %2440 = vmatprep.mubr.f32.mxu0 %v6309_v1  ;;  %2535 = vmatprep.mubr.f32.mxu1 %v6309_v1 }
 0x19e   :  { %5553 = vmatmul.mubr.msk.f32.gmra.mrb[64].mxu0 %vm1513_vm8, %v7823_v29  ;;  %5558 = vmatmul.mubr.msk.f32.gmra.mrb[66].mxu1 %vm1513_vm8, %v7810_v23 }
 0x19f   :  { %2446 = vmatprep.mubr.f32.mxu0 %v6309_v1  ;;  %2541 = vmatprep.mubr.f32.mxu1 %v6309_v1 }
 0x1a2   :  { %5554 = vmatmul.mubr.msk.f32.gmra.mrb[66].mxu0 %vm1513_vm8, %v7834_v32  ;;  %5559 = vmatmul.mubr.msk.f32.gmra.mrb[68].mxu1 %vm1513_vm8, %v7823_v29 }
 0x1a3   :  { %2452 = vmatprep.mubr.f32.mxu0 %v6309_v1  ;;  %2547 = vmatprep.mubr.f32.mxu1 %v6309_v1 }
 0x1a6   :  { %5555 = vmatmul.mubr.msk.f32.gmra.mrb[68].mxu0 %vm1513_vm8, %v1488_v35  ;;  %5560 = vmatmul.mubr.msk.f32.gmra.mrb[70].mxu1 %vm1513_vm8, %v7834_v32 }
 0x1a7   :  { %2553 = vmatprep.mubr.f32.mxu1 %v6309_v1  ;;  %2624 = vmatprep.mubr.f32.mxu0 %v6309_v1 }
 0x1aa   :  { %5561 = vmatmul.mubr.msk.f32.gmra.mrb[72].mxu1 %vm1513_vm8, %v1488_v35  ;;  %5562 = vmatmul.mubr.msk.f32.vlgmr.msra.gmra.mrb[70].mxu0 %vm1513_vm8, %v7786_v34 }
 0x1ab   :  { %5939 = vmatpush1.bf16.msra.mxu0 %v7588_v11  ;;  %2630 = vmatprep.mubr.f32.mxu0 %v6309_v1  ;;  %v7929_v11 = vld [vmem:[%s8457_s2 + $0x60] sm:$0xff] }
 0x1ac   :  { %5945 = vmatprep.subr.bf16.mxu0 %v7678_v25  ;;  %2725 = vmatprep.mubr.f32.mxu1 %v6309_v1 }
 0x1ae   :  { %5563 = vmatmul.mubr.msk.f32.gmra.mrb[72].mxu0 %vm1513_vm8, %v7797_v36  ;;  %5568 = vmatmul.mubr.msk.f32.vlgmr.msra.gmra.mrb[74].mxu1 %vm1513_vm8, %v7786_v34 }
 0x1af   :  { %5943 = vmatpush1.bf16.msra.mxu1 %v7590_v5  ;;  %2636 = vmatprep.mubr.f32.mxu0 %v6309_v1 }
 0x1b0   :  { %5949 = vmatprep.subr.bf16.mxu1 %v7680_v21  ;;  %2731 = vmatprep.mubr.f32.mxu1 %v6309_v1 }
 0x1b2   :  { %5564 = vmatmul.mubr.msk.f32.gmra.mrb[74].mxu0 %vm1513_vm8, %v7810_v23  ;;  %5569 = vmatmul.mubr.msk.f32.gmra.mrb[76].mxu1 %vm1513_vm8, %v7797_v36 }
 0x1b3   :  { %2642 = vmatprep.mubr.f32.mxu0 %v6309_v1  ;;  %2737 = vmatprep.mubr.f32.mxu1 %v6309_v1 }
 0x1b6   :  { %5565 = vmatmul.mubr.msk.f32.gmra.mrb[76].mxu0 %vm1513_vm8, %v7823_v29  ;;  %5570 = vmatmul.mubr.msk.f32.gmra.mrb[78].mxu1 %vm1513_vm8, %v7810_v23 }
 0x1b7   :  { %2648 = vmatprep.mubr.f32.mxu0 %v6309_v1  ;;  %2743 = vmatprep.mubr.f32.mxu1 %v6309_v1 }
 0x1ba   :  { %5566 = vmatmul.mubr.msk.f32.gmra.mrb[78].mxu0 %vm1513_vm8, %v7834_v32  ;;  %5571 = vmatmul.mubr.msk.f32.gmra.mrb[80].mxu1 %vm1513_vm8, %v7823_v29 }
 0x1bb   :  { %2654 = vmatprep.mubr.f32.mxu0 %v6309_v1  ;;  %2749 = vmatprep.mubr.f32.mxu1 %v6309_v1 }
 0x1be   :  { %5567 = vmatmul.mubr.msk.f32.gmra.mrb[80].mxu0 %vm1513_vm8, %v1488_v35  ;;  %5572 = vmatmul.mubr.msk.f32.gmra.mrb[86].mxu1 %vm1513_vm8, %v7834_v32 }
 0x1bf   :  { %2755 = vmatprep.mubr.f32.mxu1 %v6309_v1  ;;  %2844 = vmatprep.mubr.f32.mxu0 %v6309_v1 }
 0x1c2   :  { %5573 = vmatmul.mubr.msk.f32.gmra.mrb[88].mxu1 %vm1513_vm8, %v1488_v35  ;;  %5574 = vmatmul.mubr.msk.f32.vlgmr.msra.gmra.mrb[48].mxu0 %vm1513_vm8, %v7929_v11 }
 0x1c3   :  { %5947 = vmatpush1.bf16.msra.mxu0 %v7674_v59  ;;  %2850 = vmatprep.mubr.f32.mxu0 %v6309_v1 }
 0x1c4   :  { %5953 = vmatprep.subr.bf16.mxu0 %v7727_v10  ;;  %2945 = vmatprep.mubr.f32.mxu1 %v6309_v1 }
 0x1c6   :  { %5575 = vmatmul.mubr.msk.f32.gmra.mrb[50].mxu0 %vm1513_vm8, %v7939_v9  ;;  %5580 = vmatmul.mubr.msk.f32.vlgmr.msra.gmra.mrb[50].mxu1 %vm1513_vm8, %v7929_v11 }
 0x1c7   :  { %5951 = vmatpush1.bf16.msra.mxu1 %v7676_v14  ;;  %2856 = vmatprep.mubr.f32.mxu0 %v6309_v1 }
 0x1c8   :  { %5957 = vmatprep.subr.bf16.mxu1 %v7729_v12  ;;  %2951 = vmatprep.mubr.f32.mxu1 %v6309_v1 }
 0x1ca   :  { %5576 = vmatmul.mubr.msk.f32.gmra.mrb[52].mxu0 %vm1513_vm8, %v7952_v17  ;;  %5581 = vmatmul.mubr.msk.f32.gmra.mrb[52].mxu1 %vm1513_vm8, %v7939_v9 }
 0x1cb   :  { %2862 = vmatprep.mubr.f32.mxu0 %v6309_v1  ;;  %2957 = vmatprep.mubr.f32.mxu1 %v6309_v1 }
 0x1ce   :  { %5577 = vmatmul.mubr.msk.f32.gmra.mrb[54].mxu0 %vm1513_vm8, %v7965_v28  ;;  %5582 = vmatmul.mubr.msk.f32.gmra.mrb[54].mxu1 %vm1513_vm8, %v7952_v17 }
 0x1cf   :  { %2868 = vmatprep.mubr.f32.mxu0 %v6309_v1  ;;  %2963 = vmatprep.mubr.f32.mxu1 %v6309_v1 }
 0x1d2   :  { %5578 = vmatmul.mubr.msk.f32.gmra.mrb[56].mxu0 %vm1513_vm8, %v7976_v24  ;;  %5583 = vmatmul.mubr.msk.f32.gmra.mrb[56].mxu1 %vm1513_vm8, %v7965_v28 }
 0x1d3   :  { %2874 = vmatprep.mubr.f32.mxu0 %v6309_v1  ;;  %2969 = vmatprep.mubr.f32.mxu1 %v6309_v1 }
 0x1d6   :  { %5579 = vmatmul.mubr.msk.f32.gmra.mrb[82].mxu0 %vm1513_vm8, %v7987_v31  ;;  %5584 = vmatmul.mubr.msk.f32.gmra.mrb[58].mxu1 %vm1513_vm8, %v7976_v24 }
 0x1d7   :  { %2975 = vmatprep.mubr.f32.mxu1 %v6309_v1  ;;  %3046 = vmatprep.mubr.f32.mxu0 %v6309_v1 }
 0x1da   :  { %5585 = vmatmul.mubr.msk.f32.gmra.mrb[60].mxu1 %vm1513_vm8, %v7987_v31  ;;  %5586 = vmatmul.mubr.msk.f32.vlgmr.msra.gmra.mrb[58].mxu0 %vm1513_vm8, %v7929_v11 }
 0x1db   :  { %5955 = vmatpush1.bf16.msra.mxu0 %v7723_v7  ;;  %3052 = vmatprep.mubr.f32.mxu0 %v6309_v1 }
 0x1dc   :  { %5961 = vmatprep.subr.bf16.mxu0 %v7590_v5  ;;  %3147 = vmatprep.mubr.f32.mxu1 %v6309_v1 }
 0x1de   :  { %5587 = vmatmul.mubr.msk.f32.gmra.mrb[60].mxu0 %vm1513_vm8, %v7939_v9  ;;  %5592 = vmatmul.mubr.msk.f32.vlgmr.msra.gmra.mrb[62].mxu1 %vm1513_vm8, %v7929_v11 }
 0x1df   :  { %5959 = vmatpush1.bf16.msra.mxu1 %v7725_v8  ;;  %3058 = vmatprep.mubr.f32.mxu0 %v6309_v1 }
 0x1e0   :  { %5965 = vmatprep.subr.bf16.mxu1 %v7674_v59  ;;  %3153 = vmatprep.mubr.f32.mxu1 %v6309_v1 }
 0x1e2   :  { %5588 = vmatmul.mubr.msk.f32.gmra.mrb[62].mxu0 %vm1513_vm8, %v7952_v17  ;;  %5593 = vmatmul.mubr.msk.f32.gmra.mrb[64].mxu1 %vm1513_vm8, %v7939_v9 }
 0x1e3   :  { %3064 = vmatprep.mubr.f32.mxu0 %v6309_v1  ;;  %3159 = vmatprep.mubr.f32.mxu1 %v6309_v1 }
 0x1e6   :  { %5589 = vmatmul.mubr.msk.f32.gmra.mrb[64].mxu0 %vm1513_vm8, %v7965_v28  ;;  %5594 = vmatmul.mubr.msk.f32.gmra.mrb[66].mxu1 %vm1513_vm8, %v7952_v17 }
 0x1e7   :  { %3070 = vmatprep.mubr.f32.mxu0 %v6309_v1  ;;  %3165 = vmatprep.mubr.f32.mxu1 %v6309_v1 }
 0x1ea   :  { %5590 = vmatmul.mubr.msk.f32.gmra.mrb[66].mxu0 %vm1513_vm8, %v7976_v24  ;;  %5595 = vmatmul.mubr.msk.f32.gmra.mrb[68].mxu1 %vm1513_vm8, %v7965_v28 }
 0x1eb   :  { %3076 = vmatprep.mubr.f32.mxu0 %v6309_v1  ;;  %3171 = vmatprep.mubr.f32.mxu1 %v6309_v1 }
 0x1ee   :  { %5591 = vmatmul.mubr.msk.f32.gmra.mrb[68].mxu0 %vm1513_vm8, %v7987_v31  ;;  %5596 = vmatmul.mubr.msk.f32.gmra.mrb[70].mxu1 %vm1513_vm8, %v7976_v24 }
 0x1ef   :  { %3177 = vmatprep.mubr.f32.mxu1 %v6309_v1  ;;  %3248 = vmatprep.mubr.f32.mxu0 %v6309_v1 }
 0x1f2   :  { %5597 = vmatmul.mubr.msk.f32.gmra.mrb[72].mxu1 %vm1513_vm8, %v7987_v31  ;;  %5598 = vmatmul.mubr.msk.f32.vlgmr.msra.gmra.mrb[70].mxu0 %vm1513_vm8, %v7929_v11 }
 0x1f3   :  { %5963 = vmatpush1.bf16.msra.mxu0 %v7592_v26  ;;  %3254 = vmatprep.mubr.f32.mxu0 %v6309_v1 }
 0x1f4   :  { %5969 = vmatprep.subr.bf16.mxu0 %v7676_v14  ;;  %3349 = vmatprep.mubr.f32.mxu1 %v6309_v1 }
 0x1f6   :  { %5599 = vmatmul.mubr.msk.f32.gmra.mrb[72].mxu0 %vm1513_vm8, %v7939_v9  ;;  %5604 = vmatmul.mubr.msk.f32.vlgmr.msra.gmra.mrb[74].mxu1 %vm1513_vm8, %v7929_v11 }
 0x1f7   :  { %5967 = vmatpush1.bf16.msra.mxu1 %v7596_v22  ;;  %3260 = vmatprep.mubr.f32.mxu0 %v6309_v1 }
 0x1f8   :  { %5973 = vmatprep.subr.bf16.mxu1 %v7723_v7  ;;  %3355 = vmatprep.mubr.f32.mxu1 %v6309_v1 }
 0x1fa   :  { %5600 = vmatmul.mubr.msk.f32.gmra.mrb[74].mxu0 %vm1513_vm8, %v7952_v17  ;;  %5605 = vmatmul.mubr.msk.f32.gmra.mrb[76].mxu1 %vm1513_vm8, %v7939_v9 }
 0x1fb   :  { %3266 = vmatprep.mubr.f32.mxu0 %v6309_v1  ;;  %3361 = vmatprep.mubr.f32.mxu1 %v6309_v1 }
 0x1fe   :  { %5601 = vmatmul.mubr.msk.f32.gmra.mrb[76].mxu0 %vm1513_vm8, %v7965_v28  ;;  %5606 = vmatmul.mubr.msk.f32.gmra.mrb[78].mxu1 %vm1513_vm8, %v7952_v17 }
 0x1ff   :  { %3272 = vmatprep.mubr.f32.mxu0 %v6309_v1  ;;  %3367 = vmatprep.mubr.f32.mxu1 %v6309_v1 }
 0x202   :  { %5602 = vmatmul.mubr.msk.f32.gmra.mrb[78].mxu0 %vm1513_vm8, %v7976_v24  ;;  %5607 = vmatmul.mubr.msk.f32.gmra.mrb[80].mxu1 %vm1513_vm8, %v7965_v28 }
 0x203   :  { %3278 = vmatprep.mubr.f32.mxu0 %v6309_v1  ;;  %3373 = vmatprep.mubr.f32.mxu1 %v6309_v1 }
 0x204   :  { %v8069_v26 = vpop.f32.mrb[48].mxu1 }
 0x205   :  { %v8071_v2 = vpop.f32.mrb[49].mxu1 }
 0x206   :  { %5603 = vmatmul.mubr.msk.f32.gmra.mrb[80].mxu0 %vm1513_vm8, %v7987_v31  ;;  %5608 = vmatmul.mubr.msk.f32.gmra.mrb[90].mxu1 %vm1513_vm8, %v7976_v24 }
 0x207   :  { %3379 = vmatprep.mubr.f32.mxu1 %v6309_v1  ;;  %3540 = vmatprep.mubr.f32.mxu0 %v6309_v1 }
 0x20a   :  { %5609 = vmatmul.mubr.msk.f32.gmra.mrb[92].mxu1 %vm1513_vm8, %v7987_v31  ;;  %5610 = vmatmul.mubr.msk.f32.vlgmr.msra.gmra.mrb[48].mxu0 %vm1513_vm8, %v8082_v4 }
 0x20b   :  { %5971 = vmatpush1.bf16.msra.mxu0 %v7678_v25  ;;  %3546 = vmatprep.mubr.f32.mxu0 %v6309_v1 }
 0x20c   :  { %5977 = vmatprep.subr.bf16.mxu0 %v7725_v8  ;;  %3641 = vmatprep.mubr.f32.mxu1 %v6309_v1 }
 0x20e   :  { %5611 = vmatmul.mubr.msk.f32.gmra.mrb[50].mxu0 %vm1513_vm8, %v8093_v37  ;;  %5616 = vmatmul.mubr.msk.f32.vlgmr.msra.gmra.mrb[50].mxu1 %vm1513_vm8, %v8082_v4 }
 0x20f   :  { %5975 = vmatpush1.bf16.msra.mxu1 %v7680_v21  ;;  %3552 = vmatprep.mubr.f32.mxu0 %v6309_v1 }
 0x210   :  { %5981 = vmatprep.subr.bf16.mxu1 %v7729_v12  ;;  %3647 = vmatprep.mubr.f32.mxu1 %v6309_v1 }
 0x212   :  { %5612 = vmatmul.mubr.msk.f32.gmra.mrb[52].mxu0 %vm1513_vm8, %v1503_v13  ;;  %5617 = vmatmul.mubr.msk.f32.gmra.mrb[52].mxu1 %vm1513_vm8, %v8093_v37 }
 0x213   :  { %3558 = vmatprep.mubr.f32.mxu0 %v6309_v1  ;;  %3653 = vmatprep.mubr.f32.mxu1 %v6309_v1 }
 0x216   :  { %5613 = vmatmul.mubr.msk.f32.gmra.mrb[54].mxu0 %vm1513_vm8, %v1504_v39  ;;  %5618 = vmatmul.mubr.msk.f32.gmra.mrb[54].mxu1 %vm1513_vm8, %v1503_v13 }
 0x217   :  { %3564 = vmatprep.mubr.f32.mxu0 %v6309_v1  ;;  %3659 = vmatprep.mubr.f32.mxu1 %v6309_v1 }
 0x21a   :  { %5614 = vmatmul.mubr.msk.f32.gmra.mrb[56].mxu0 %vm1513_vm8, %v1505_v40  ;;  %5619 = vmatmul.mubr.msk.f32.gmra.mrb[56].mxu1 %vm1513_vm8, %v1504_v39 }
 0x21b   :  { %3570 = vmatprep.mubr.f32.mxu0 %v6309_v1  ;;  %3665 = vmatprep.mubr.f32.mxu1 %v6309_v1 }
 0x21e   :  { %5615 = vmatmul.mubr.msk.f32.gmra.mrb[82].mxu0 %vm1513_vm8, %v8130_v42  ;;  %5620 = vmatmul.mubr.msk.f32.gmra.mrb[58].mxu1 %vm1513_vm8, %v1505_v40 }
 0x21f   :  { %3671 = vmatprep.mubr.f32.mxu1 %v6309_v1  ;;  %3742 = vmatprep.mubr.f32.mxu0 %v6309_v1 }
 0x222   :  { %5621 = vmatmul.mubr.msk.f32.gmra.mrb[60].mxu1 %vm1513_vm8, %v8130_v42  ;;  %5622 = vmatmul.mubr.msk.f32.vlgmr.msra.gmra.mrb[58].mxu0 %vm1513_vm8, %v8082_v4 }
 0x223   :  { %5979 = vmatpush1.bf16.msra.mxu0 %v7727_v10  ;;  %3748 = vmatprep.mubr.f32.mxu0 %v6309_v1 }
 0x224   :  { %5985 = vmatprep.subr.bf16.mxu0 %v7596_v22  ;;  %3843 = vmatprep.mubr.f32.mxu1 %v6309_v1 }
 0x226   :  { %5623 = vmatmul.mubr.msk.f32.gmra.mrb[60].mxu0 %vm1513_vm8, %v8093_v37  ;;  %5628 = vmatmul.mubr.msk.f32.vlgmr.msra.gmra.mrb[62].mxu1 %vm1513_vm8, %v8082_v4 }
 0x227   :  { %5983 = vmatpush3.bf16.msra.mxu1 %v7729_v12  ;;  %3754 = vmatprep.mubr.f32.mxu0 %v6309_v1 }
 0x228   :  { %5989 = vmatprep.subr.bf16.mxu1 %v7678_v25  ;;  %3849 = vmatprep.mubr.f32.mxu1 %v6309_v1  ;;  %v8210_v25 = vld [vmem:[%s8457_s2 + $0xc8] sm:$0xff] }
 0x22a   :  { %5624 = vmatmul.mubr.msk.f32.gmra.mrb[62].mxu0 %vm1513_vm8, %v1503_v13  ;;  %5629 = vmatmul.mubr.msk.f32.gmra.mrb[64].mxu1 %vm1513_vm8, %v8093_v37 }
 0x22b   :  { %3760 = vmatprep.mubr.f32.mxu0 %v6309_v1  ;;  %3855 = vmatprep.mubr.f32.mxu1 %v6309_v1 }
 0x22e   :  { %5625 = vmatmul.mubr.msk.f32.gmra.mrb[64].mxu0 %vm1513_vm8, %v1504_v39  ;;  %5630 = vmatmul.mubr.msk.f32.gmra.mrb[66].mxu1 %vm1513_vm8, %v1503_v13 }
 0x22f   :  { %3766 = vmatprep.mubr.f32.mxu0 %v6309_v1  ;;  %3861 = vmatprep.mubr.f32.mxu1 %v6309_v1 }
 0x232   :  { %5626 = vmatmul.mubr.msk.f32.gmra.mrb[66].mxu0 %vm1513_vm8, %v1505_v40  ;;  %5631 = vmatmul.mubr.msk.f32.gmra.mrb[68].mxu1 %vm1513_vm8, %v1504_v39 }
 0x233   :  { %3772 = vmatprep.mubr.f32.mxu0 %v6309_v1  ;;  %3867 = vmatprep.mubr.f32.mxu1 %v6309_v1 }
 0x236   :  { %5627 = vmatmul.mubr.msk.f32.gmra.mrb[68].mxu0 %vm1513_vm8, %v8130_v42  ;;  %5632 = vmatmul.mubr.msk.f32.gmra.mrb[70].mxu1 %vm1513_vm8, %v1505_v40 }
 0x237   :  { %3873 = vmatprep.mubr.f32.mxu1 %v6309_v1  ;;  %3944 = vmatprep.mubr.f32.mxu0 %v6309_v1 }
 0x23a   :  { %5633 = vmatmul.mubr.msk.f32.gmra.mrb[72].mxu1 %vm1513_vm8, %v8130_v42  ;;  %5634 = vmatmul.mubr.msk.f32.vlgmr.msra.gmra.mrb[70].mxu0 %vm1513_vm8, %v8082_v4 }
 0x23b   :  { %5987 = vmatpush1.bf16.msra.mxu0 %v7590_v5  ;;  %3950 = vmatprep.mubr.f32.mxu0 %v6309_v1  ;;  %v8200_v5 = vld [vmem:[%s8457_s2 + $0xc0] sm:$0xff] }
 0x23c   :  { %5993 = vmatprep.subr.bf16.mxu0 %v7680_v21  ;;  %5719 = vmatprep.mubr.msk.f32.mxu1 %vm1513_vm8, %v8082_v4 }
 0x23e   :  { %5635 = vmatmul.mubr.msk.f32.gmra.mrb[72].mxu0 %vm1513_vm8, %v8093_v37  ;;  %5720 = vmatmul.mubr.msk.f32.vlgmr.msra.gmra.mrb[94].mxu1 %vm1513_vm8, %v8093_v37 }
 0x23f   :  { %5991 = vmatpush1.bf16.msra.mxu1 %v7674_v59  ;;  %3956 = vmatprep.mubr.f32.mxu0 %v6309_v1 }
 0x240   :  { %5997 = vmatprep.subr.bf16.mxu1 %v7727_v10  ;;  %5722 = vmatprep.mubr.msk.f32.mxu1 %vm1513_vm8, %v1503_v13 }
 0x242   :  { %5636 = vmatmul.mubr.msk.f32.gmra.mrb[74].mxu0 %vm1513_vm8, %v1503_v13  ;;  %5723 = vmatmul.mubr.msk.f32.gmra.mrb[96].mxu1 %vm1513_vm8, %v1504_v39 }
 0x243   :  { %3962 = vmatprep.mubr.f32.mxu0 %v6309_v1  ;;  %5725 = vmatprep.mubr.msk.f32.mxu1 %vm1513_vm8, %v1505_v40 }
 0x246   :  { %5637 = vmatmul.mubr.msk.f32.gmra.mrb[76].mxu0 %vm1513_vm8, %v1504_v39  ;;  %5726 = vmatmul.mubr.msk.f32.gmra.mrb[98].mxu1 %vm1513_vm8, %v8130_v42 }
 0x247   :  { %3968 = vmatprep.mubr.f32.mxu0 %v6309_v1  ;;  %4337 = vmatprep.mubr.f32.mxu1 %v6309_v1 }
 0x249   :  { %v2127_v22 = vpop.f32.mrb[82].mxu1 }
 0x24a   :  { %5638 = vmatmul.mubr.msk.f32.gmra.mrb[78].mxu0 %vm1513_vm8, %v1505_v40  ;;  %5652 = vmatmul.mubr.msk.f32.vlgmr.msra.gmra.mrb[50].mxu1 %vm1513_vm8, %v8200_v5  ;;  %v2129_v59 = vpop.f32.mrb[83].mxu1 }
 0x24b   :  { %5999 = vmatpush1.bf16.msra.mxu1 %v7723_v7  ;;  %3974 = vmatprep.mubr.f32.mxu0 %v6309_v1 }
 0x24c   :  { %4343 = vmatprep.mubr.f32.mxu1 %v6309_v1  ;;  %5728 = vmatprep.subr.mxu1 %v6309_v1 }
 0x24d   :  { %v2133_v21 = vpop.f32.mrb[84].mxu1 }
 0x24e   :  { %5639 = vmatmul.mubr.msk.f32.gmra.mrb[80].mxu0 %vm1513_vm8, %v8130_v42  ;;  %5653 = vmatmul.mubr.msk.f32.gmra.mrb[52].mxu1 %vm1513_vm8, %v8210_v25  ;;  %v2135_v43 = vpop.f32.mrb[85].mxu1 }
 0x24f   :  { %4236 = vmatprep.mubr.f32.mxu0 %v6309_v1  ;;  %4349 = vmatprep.mubr.f32.mxu1 %v6309_v1 }
 0x252   :  { %5646 = vmatmul.mubr.msk.f32.vlgmr.msra.gmra.mrb[48].mxu0 %vm1513_vm8, %v8200_v5  ;;  %5654 = vmatmul.mubr.msk.f32.gmra.mrb[54].mxu1 %vm1513_vm8, %v8223_v16 }
 0x253   :  { %5995 = vmatpush1.bf16.msra.mxu0 %v7676_v14  ;;  %4242 = vmatprep.mubr.f32.mxu0 %v6309_v1  ;;  %v8245_v14 = vld [vmem:[%s8459_s4] sm:$0xff] }
 0x254   :  { %6001 = vmatprep.subr.bf16.mxu0 %v7729_v12  ;;  %4355 = vmatprep.mubr.f32.mxu1 %v6309_v1 }
 0x255   :  { %4948 = vperm.xlu0 %6281, %v8245_v14  }
 0x256   :  { %5647 = vmatmul.mubr.msk.f32.gmra.mrb[50].mxu0 %vm1513_vm8, %v8210_v25  ;;  %5655 = vmatmul.mubr.msk.f32.gmra.mrb[56].mxu1 %vm1513_vm8, %v8234_v45 }
 0x257   :  { %4248 = vmatprep.mubr.f32.mxu0 %v6309_v1  ;;  %4361 = vmatprep.mubr.f32.mxu1 %v6309_v1 }
 0x259   :  { %4953 = vperm.xlu0 %6281, %v8268_v19  }
 0x25a   :  { %5648 = vmatmul.mubr.msk.f32.gmra.mrb[52].mxu0 %vm1513_vm8, %v8223_v16  ;;  %5656 = vmatmul.mubr.msk.f32.gmra.mrb[58].mxu1 %vm1513_vm8, %v8257_v18 }
 0x25b   :  { %4254 = vmatprep.mubr.f32.mxu0 %v6309_v1  ;;  %4367 = vmatprep.mubr.f32.mxu1 %v6309_v1 }
 0x25d   :  { %4968 = vperm.xlu0 %6281, %v8288_v33  }
 0x25e   :  { %5649 = vmatmul.mubr.msk.f32.gmra.mrb[54].mxu0 %vm1513_vm8, %v8234_v45  ;;  %5657 = vmatmul.mubr.msk.f32.gmra.mrb[60].mxu1 %vm1513_vm8, %v1512_v20 }
 0x25f   :  { %4260 = vmatprep.mubr.f32.mxu0 %v6309_v1  ;;  %4539 = vmatprep.mubr.f32.mxu1 %v6309_v1 }
 0x261   :  { %6283 = vset.pattern.permute.xlu0 %v6312_v63 }
 0x262   :  { %5650 = vmatmul.mubr.msk.f32.gmra.mrb[56].mxu0 %vm1513_vm8, %v8257_v18  ;;  %5664 = vmatmul.mubr.msk.f32.vlgmr.msra.gmra.mrb[62].mxu1 %vm1513_vm8, %v8200_v5 }
 0x263   :  { %4266 = vmatprep.mubr.f32.mxu0 %v6309_v1  ;;  %4545 = vmatprep.mubr.f32.mxu1 %v6309_v1 }
 0x264   :  { %5729 = vmatpush3.msra.mxu1 %v6309_v1  ;;  %4995 = vperm.xlu0 %6283, %v8245_v14  }
 0x266   :  { %5651 = vmatmul.mubr.msk.f32.gmra.mrb[82].mxu0 %vm1513_vm8, %v1512_v20  ;;  %5665 = vmatmul.mubr.msk.f32.gmra.mrb[64].mxu1 %vm1513_vm8, %v8210_v25 }
 0x267   :  { %4438 = vmatprep.mubr.f32.mxu0 %v6309_v1  ;;  %4551 = vmatprep.mubr.f32.mxu1 %v6309_v1 }
 0x268   :  { %5007 = vperm.xlu0 %6283, %v8273_v48  }
 0x26a   :  { %5658 = vmatmul.mubr.msk.f32.vlgmr.msra.gmra.mrb[58].mxu0 %vm1513_vm8, %v8200_v5  ;;  %5666 = vmatmul.mubr.msk.f32.gmra.mrb[66].mxu1 %vm1513_vm8, %v8223_v16 }
 0x26b   :  { %6003 = vmatpush1.bf16.msra.mxu0 %v7725_v8  ;;  %4444 = vmatprep.mubr.f32.mxu0 %v6309_v1 }
 0x26c   :  { %4557 = vmatprep.mubr.f32.mxu1 %v6309_v1  ;;  %5015 = vperm.xlu0 %6283, %v8293_v38  }
 0x26e   :  { %5659 = vmatmul.mubr.msk.f32.gmra.mrb[60].mxu0 %vm1513_vm8, %v8210_v25  ;;  %5667 = vmatmul.mubr.msk.f32.gmra.mrb[68].mxu1 %vm1513_vm8, %v8234_v45 }
 0x26f   :  { %4450 = vmatprep.mubr.f32.mxu0 %v6309_v1  ;;  %4563 = vmatprep.mubr.f32.mxu1 %v6309_v1 }
 0x272   :  { %5660 = vmatmul.mubr.msk.f32.gmra.mrb[62].mxu0 %vm1513_vm8, %v8223_v16  ;;  %5668 = vmatmul.mubr.msk.f32.gmra.mrb[70].mxu1 %vm1513_vm8, %v8257_v18 }
 0x273   :  { %4456 = vmatprep.mubr.f32.mxu0 %v6309_v1  ;;  %4569 = vmatprep.mubr.f32.mxu1 %v6309_v1 }
 0x276   :  { %5661 = vmatmul.mubr.msk.f32.gmra.mrb[64].mxu0 %vm1513_vm8, %v8234_v45  ;;  %5669 = vmatmul.mubr.msk.f32.gmra.mrb[72].mxu1 %vm1513_vm8, %v1512_v20 }
 0x277   :  { %4462 = vmatprep.mubr.f32.mxu0 %v6309_v1  ;;  %5730 = vmatprep.mubr.msk.f32.mxu1 %vm1513_vm8, %v8200_v5 }
 0x27a   :  { %5662 = vmatmul.mubr.msk.f32.gmra.mrb[66].mxu0 %vm1513_vm8, %v8257_v18  ;;  %5731 = vmatmul.mubr.msk.f32.vlgmr.msra.gmra.mrb[100].mxu1 %vm1513_vm8, %v8210_v25 }
 0x27b   :  { %4468 = vmatprep.mubr.f32.mxu0 %v6309_v1  ;;  %5733 = vmatprep.mubr.msk.f32.mxu1 %vm1513_vm8, %v8223_v16 }
 0x27e   :  { %5663 = vmatmul.mubr.msk.f32.gmra.mrb[68].mxu0 %vm1513_vm8, %v1512_v20  ;;  %5734 = vmatmul.mubr.msk.f32.gmra.mrb[102].mxu1 %vm1513_vm8, %v8234_v45 }
 0x27f   :  { %4640 = vmatprep.mubr.f32.mxu0 %v6309_v1  ;;  %5736 = vmatprep.mubr.msk.f32.mxu1 %vm1513_vm8, %v8257_v18 }
 0x282   :  { %5670 = vmatmul.mubr.msk.f32.vlgmr.msra.gmra.mrb[70].mxu0 %vm1513_vm8, %v8200_v5  ;;  %5737 = vmatmul.mubr.msk.f32.gmra.mrb[104].mxu1 %vm1513_vm8, %v1512_v20 }
 0x283   :  { %4646 = vmatprep.mubr.f32.mxu0 %v6309_v1 }
 0x286   :  { %5671 = vmatmul.mubr.msk.f32.gmra.mrb[72].mxu0 %vm1513_vm8, %v8210_v25 }
 0x287   :  { %4652 = vmatprep.mubr.f32.mxu0 %v6309_v1 }
 0x28a   :  { %5672 = vmatmul.mubr.msk.f32.gmra.mrb[74].mxu0 %vm1513_vm8, %v8223_v16 }
 0x28b   :  { %4658 = vmatprep.mubr.f32.mxu0 %v6309_v1 }
 0x28e   :  { %5673 = vmatmul.mubr.msk.f32.gmra.mrb[76].mxu0 %vm1513_vm8, %v8234_v45 }
 0x28f   :  { %4664 = vmatprep.mubr.f32.mxu0 %v6309_v1 }
 0x291   :  { %v2751_v49 = vpop.f32.mrb[86].mxu1 }
 0x292   :  { %5674 = vmatmul.mubr.msk.f32.gmra.mrb[78].mxu0 %vm1513_vm8, %v8257_v18  ;;  %v2753_v30 = vpop.f32.mrb[87].mxu1 }
 0x293   :  { %4670 = vmatprep.mubr.f32.mxu0 %v6309_v1  ;;  %v4988_v1 = vld [vmem:[%s8458_s3] sm:$0xff] }
 0x294   :  { %5751 = vmatprep.mubr.msk.f32.mxu1 %vm5018_vm11, %v4988_v1 }
 0x295   :  { %v2757_v44 = vpop.f32.mrb[88].mxu1 }
 0x296   :  { %5675 = vmatmul.mubr.msk.f32.gmra.mrb[80].mxu0 %vm1513_vm8, %v1512_v20  ;;  %v2759_v50 = vpop.f32.mrb[89].mxu1 }
 0x2c9   :  { %v3351_v51 = vpop.f32.mrb[74].mxu1 }
 0x2ca   :  { %v8366_v53 = vpop.f32.mrb[75].mxu1 }
 0x2cd   :  { %v3357_v54 = vpop.f32.mrb[76].mxu1 }
 0x2ce   :  { %v8368_v55 = vpop.f32.mrb[77].mxu1 }
 0x2d1   :  { %v3363_v41 = vpop.f32.mrb[78].mxu1 }
 0x2d2   :  { %v3365_v56 = vpop.f32.mrb[79].mxu1 }
 0x2d5   :  { %v3369_v57 = vpop.f32.mrb[80].mxu1 }
 0x2d6   :  { %v3371_v58 = vpop.f32.mrb[81].mxu1 }
 0x2d9   :  { %v3375_v52 = vpop.f32.mrb[90].mxu1 }
 0x2da   :  { %v3377_v60 = vpop.f32.mrb[91].mxu1 }
 0x2dd   :  { %v3381_v61 = vpop.f32.mrb[92].mxu1 }
 0x2de   :  { %v3383_v62 = vpop.f32.mrb[93].mxu1 }
 0x311   :  { %v5721_v0 = vpop.f32.mrb[94].mxu1 }
 0x312   :  { %v8380_v3 = vadd.f32 %v5721_v0, %v3357_v54  ;;  %v4047_v6 = vpop.f32.mrb[95].mxu1 }
 0x313   :  { %v8382_v47 = vadd.f32 %v4047_v6, %v3351_v51 }
 0x315   :  { %v5724_v7 = vpop.f32.mrb[96].mxu1 }
 0x316   :  { %v8384_v15 = vadd.f32 %v5724_v7, %v3369_v57  ;;  %v4059_v8 = vpop.f32.mrb[97].mxu1 }
 0x317   :  { %v8386_v10 = vadd.f32 %v4059_v8, %v3363_v41 }
 0x319   :  { %v5727_v12 = vpop.f32.mrb[98].mxu1 }
 0x31a   :  { %v4071_v34 = vpop.f32.mrb[99].mxu1 }
 0x31d   :  { %v4339_v36 = vpop.f32.mrb[50].mxu1 }
 0x31e   :  { %v4341_v23 = vpop.f32.mrb[51].mxu1 }
 0x321   :  { %v4345_v29 = vpop.f32.mrb[52].mxu1 }
 0x322   :  { %v4347_v32 = vpop.f32.mrb[53].mxu1 }
 0x325   :  { %v4238_v35 = vpop.f32.mrb[48].mxu0  ;;  %v4351_v11 = vpop.f32.mrb[54].mxu1 }
 0x326   :  { %v4240_v9 = vpop.f32.mrb[49].mxu0  ;;  %v4353_v17 = vpop.f32.mrb[55].mxu1 }
 0x327   :  { %v4850_v28 = vmax.f32 %v4238_v35, %v4240_v9 }
 0x329   :  { %v4856_v24 = vmax.f32 %v4850_v28, %v4339_v36  ;;  %v4244_v31 = vpop.f32.mrb[50].mxu0  ;;  %v4357_v4 = vpop.f32.mrb[56].mxu1 }
 0x32a   :  { %v4246_v37 = vpop.f32.mrb[51].mxu0  ;;  %v4359_v13 = vpop.f32.mrb[57].mxu1 }
 0x32b   :  { %v4851_v39 = vmax.f32 %v4244_v31, %v4246_v37  ;;  %v4862_v40 = vmax.f32 %v4856_v24, %v4341_v23 }
 0x32d   :  { %v4857_v42 = vmax.f32 %v4851_v39, %v4345_v29  ;;  %v4250_v5 = vpop.f32.mrb[52].mxu0  ;;  %v4363_v22 = vpop.f32.mrb[58].mxu1 }
 0x32e   :  { %v4252_v59 = vpop.f32.mrb[53].mxu0  ;;  %v4365_v25 = vpop.f32.mrb[59].mxu1 }
 0x32f   :  { %v4852_v21 = vmax.f32 %v4250_v5, %v4252_v59  ;;  %v4863_v43 = vmax.f32 %v4857_v42, %v4347_v32 }
 0x331   :  { %v4858_v16 = vmax.f32 %v4852_v21, %v4351_v11  ;;  %v4256_v45 = vpop.f32.mrb[54].mxu0  ;;  %v4369_v14 = vpop.f32.mrb[60].mxu1 }
 0x332   :  { %v4258_v46 = vpop.f32.mrb[55].mxu0  ;;  %v8388_v18 = vpop.f32.mrb[61].mxu1 }
 0x333   :  { %v4853_v27 = vmax.f32 %v4256_v45, %v4258_v46  ;;  %v4864_v19 = vmax.f32 %v4858_v16, %v4353_v17 }
 0x335   :  { %v4859_v48 = vmax.f32 %v4853_v27, %v4357_v4  ;;  %v4262_v20 = vpop.f32.mrb[56].mxu0  ;;  %v4541_v33 = vpop.f32.mrb[62].mxu1 }
 0x336   :  { %v4264_v38 = vpop.f32.mrb[57].mxu0  ;;  %v8390_v49 = vpop.f32.mrb[63].mxu1 }
 0x337   :  { %v4854_v30 = vmax.f32 %v4262_v20, %v4264_v38  ;;  %v4865_v44 = vmax.f32 %v4859_v48, %v4359_v13 }
 0x339   :  { %v4860_v50 = vmax.f32 %v4854_v30, %v4363_v22  ;;  %v4268_v51 = vpop.f32.mrb[82].mxu0  ;;  %v4547_v54 = vpop.f32.mrb[64].mxu1 }
 0x33a   :  { %v6018_v41 = vadd.f32 %v4268_v51, %v8069_v26  ;;  %v4270_v56 = vpop.f32.mrb[83].mxu0  ;;  %v8393_v57 = vpop.f32.mrb[65].mxu1 }
 0x33b   :  { %v6019_v58 = vadd.f32 %v4270_v56, %v8071_v2  ;;  %v4866_v52 = vmax.f32 %v4860_v50, %v4365_v25 }
 0x33d   :  { %v4855_v60 = vmax.f32 %v6018_v41, %v6019_v58  ;;  %v4440_v61 = vpop.f32.mrb[58].mxu0  ;;  %v4553_v62 = vpop.f32.mrb[66].mxu1 }
 0x33e   :  { %v4868_v1 = vmax.f32 %v4862_v40, %v4440_v61  ;;  %v4442_v63 = vpop.f32.mrb[59].mxu0  ;;  %v8396_v0 = vpop.f32.mrb[67].mxu1 }
 0x33f   :  { %v4861_v6 = vmax.f32 %v4855_v60, %v4369_v14 }
 0x340   :  { %v4874_v7 = vmax.f32 %v4868_v1, %v4442_v63  ;;  %v4949_v63 = vpop.permute.xlu0 %4948 }
 0x341   :  { %v4446_v8 = vpop.f32.mrb[60].mxu0  ;;  %v4559_v12 = vpop.f32.mrb[68].mxu1  ;;  %v4867_v34 = vmax.f32 %v4861_v6, %v8388_v18 }
 0x342   :  { %v4880_v26 = vmax.f32 %v4874_v7, %v4541_v33  ;;  %v4869_v36 = vmax.f32 %v4863_v43, %v4446_v8  ;;  %v4448_v23 = vpop.f32.mrb[61].mxu0  ;;  %v8399_v29 = vpop.f32.mrb[69].mxu1 }
 0x344   :  { %v4875_v2 = vmax.f32 %v4869_v36, %v4448_v23  ;;  %v4886_v32 = vmax.f32 %v4880_v26, %v8390_v49  ;;  %v4954_v36 = vpop.permute.xlu0 %4953 }
 0x345   :  { %v4452_v35 = vpop.f32.mrb[62].mxu0  ;;  %v4565_v11 = vpop.f32.mrb[70].mxu1 }
 0x346   :  { %v4881_v9 = vmax.f32 %v4875_v2, %v4547_v54  ;;  %v4870_v17 = vmax.f32 %v4864_v19, %v4452_v35  ;;  %v4454_v28 = vpop.f32.mrb[63].mxu0  ;;  %v8402_v24 = vpop.f32.mrb[71].mxu1 }
 0x347   :  { %v4959_v2 = vpop.permute.xlu1 %4958 }
 0x348   :  { %v4876_v31 = vmax.f32 %v4870_v17, %v4454_v28  ;;  %v4887_v4 = vmax.f32 %v4881_v9, %v8393_v57 }
 0x349   :  { %v4458_v37 = vpop.f32.mrb[64].mxu0  ;;  %v4571_v13 = vpop.f32.mrb[72].mxu1 }
 0x34a   :  { %v4882_v39 = vmax.f32 %v4876_v31, %v4553_v62  ;;  %v4871_v40 = vmax.f32 %v4865_v44, %v4458_v37  ;;  %v4460_v42 = vpop.f32.mrb[65].mxu0  ;;  %v8405_v5 = vpop.f32.mrb[73].mxu1 }
 0x34c   :  { %v4877_v22 = vmax.f32 %v4871_v40, %v4460_v42  ;;  %v4888_v59 = vmax.f32 %v4882_v39, %v8396_v0  ;;  %v4964_v40 = vpop.permute.xlu1 %4963 }
 0x34d   :  { %v4464_v25 = vpop.f32.mrb[66].mxu0  ;;  %v5732_v21 = vpop.f32.mrb[100].mxu1 }
 0x34e   :  { %v4883_v43 = vmax.f32 %v4877_v22, %v4559_v12  ;;  %v4872_v16 = vmax.f32 %v4866_v52, %v4464_v25  ;;  %v4800_v45 = vadd.f32 %v5732_v21, %v8380_v3  ;;  %v4466_v14 = vpop.f32.mrb[67].mxu0  ;;  %v4743_v46 = vpop.f32.mrb[101].mxu1 }
 0x34f   :  { %v4788_v18 = vadd.f32 %v4743_v46, %v8382_v47 }
 0x350   :  { %v4878_v27 = vmax.f32 %v4872_v16, %v4466_v14  ;;  %v4889_v19 = vmax.f32 %v4883_v43, %v8399_v29  ;;  %v4969_v43 = vpop.permute.xlu0 %4968  ;;  %v4974_v46 = vpop.permute.xlu1 %4973 }
 0x351   :  { %v4470_v48 = vpop.f32.mrb[68].mxu0  ;;  %v5735_v20 = vpop.f32.mrb[102].mxu1 }
 0x352   :  { %v4884_v33 = vmax.f32 %v4878_v27, %v4565_v11  ;;  %v4873_v38 = vmax.f32 %v4867_v34, %v4470_v48  ;;  %v4824_v49 = vadd.f32 %v5735_v20, %v8384_v15  ;;  %v4472_v30 = vpop.f32.mrb[69].mxu0  ;;  %v4755_v44 = vpop.f32.mrb[103].mxu1  ;;  %v4989_v20 = vld [vmem:[%s8458_s3 + $0x8] sm:$0xff] }
 0x353   :  { %v4812_v50 = vadd.f32 %v4755_v44, %v8386_v10 }
 0x354   :  { %v4879_v51 = vmax.f32 %v4873_v38, %v4472_v30  ;;  %v4890_v3 = vmax.f32 %v4884_v33, %v8402_v24  ;;  %v4990_v33 = vld [vmem:[%s8458_s3 + $0x10] sm:$0xff]  ;;  %v4991_v38 = vld [vmem:[%s8458_s3 + $0x18] sm:$0xff]  ;;  %v4993_v30 = vld [vmem:[%s8458_s3 + $0x28] sm:$0xff]  ;;  %v4996_v44 = vpop.permute.xlu0 %4995 }
 0x355   :  { %v4642_v54 = vpop.f32.mrb[70].mxu0  ;;  %v5738_v41 = vpop.f32.mrb[104].mxu1 }
 0x356   :  { %v4885_v56 = vmax.f32 %v4879_v51, %v4571_v13  ;;  %v4892_v47 = vmax.f32 %v4886_v32, %v4642_v54  ;;  %v4644_v57 = vpop.f32.mrb[71].mxu0  ;;  %v4767_v58 = vpop.f32.mrb[105].mxu1 }
 0x358   :  { %v4898_v52 = vmax.f32 %v4892_v47, %v4644_v57  ;;  %v4891_v60 = vmax.f32 %v4885_v56, %v8405_v5  ;;  %v5008_v56 = vpop.permute.xlu0 %5007 }
 0x359   :  { %v4648_v61 = vpop.f32.mrb[72].mxu0 }
 0x35a   :  { %v4910_v62 = vmax.f32 %v4898_v52, %v4788_v18  ;;  %v4893_v1 = vmax.f32 %v4887_v4, %v4648_v61  ;;  %v4650_v15 = vpop.f32.mrb[73].mxu0 }
 0x35c   :  { %v4899_v0 = vmax.f32 %v4893_v1, %v4650_v15  ;;  %v4928_v10 = vmax.f32 %v4910_v62, %v8366_v53 }
 0x35d   :  { %v4654_v6 = vpop.f32.mrb[74].mxu0 }
 0x35e   :  { %v4911_v7 = vmax.f32 %v4899_v0, %v4800_v45  ;;  %v4894_v8 = vmax.f32 %v4888_v59, %v4654_v6  ;;  %v4656_v12 = vpop.f32.mrb[75].mxu0  ;;  %v8416_v34 = vadd.f32 %v4949_v63, %v4928_v10  ;;  %v5016_v10 = vpop.permute.xlu0 %5015 }
 0x360   :  { %v4900_v26 = vmax.f32 %v4894_v8, %v4656_v12  ;;  %v4929_v23 = vmax.f32 %v4911_v7, %v8368_v55  ;;  %v4982_v17 = vmax.f32 %v8416_v34, 0.0 }
 0x361   :  { %v4660_v29 = vpop.f32.mrb[76].mxu0 }
 0x362   :  { %v4977_v32 = vadd.f32 %v4954_v36, %v4929_v23  ;;  %v4895_v35 = vmax.f32 %v4889_v19, %v4660_v29  ;;  %v4662_v11 = vpop.f32.mrb[77].mxu0  ;;  %v4912_v9 = vmax.f32 %v4900_v26, %v4812_v50  ;;  %v5000_v50 = vpop.permute.xlu1 %4999 }
 0x364   :  { %v4983_v28 = vmax.f32 %v4977_v32, 0.0  ;;  %v4901_v53 = vmax.f32 %v4895_v35, %v4662_v11  ;;  %v8420_v4 = vadd.f32 %v4959_v2, %v4912_v9 }
 0x365   :  { %v4666_v24 = vpop.f32.mrb[78].mxu0 }
 0x366   :  { %v6004_v31 = vpack.c.bf16 %v4983_v28, %v4982_v17  ;;  %v4896_v37 = vmax.f32 %v4890_v3, %v4666_v24  ;;  %v4668_v13 = vpop.f32.mrb[79].mxu0  ;;  %v4913_v39 = vmax.f32 %v4901_v53, %v4824_v49  ;;  %v4984_v22 = vmax.f32 %v8420_v4, 0.0  ;;  %v4992_v49 = vld [vmem:[%s8458_s3 + $0x20] sm:$0xff]  ;;  %v5004_v57 = vpop.permute.xlu1 %5003  ;;  %s6313_s3 = smov [#allocation2]  }
 0x367   :  { %s5155_s8 = sshll.u32 %s6313_s3, 4  ;;  %s5156_s8 = int_to_ptr.vmem [resolvable:$true] %s5155_s8 }
 0x368   :  { %v4902_v42 = vmax.f32 %v4896_v37, %v4668_v13  ;;  %v4979_v55 = vadd.f32 %v4964_v40, %v4913_v39  ;;  %6005 = vmatprep.subr.bf16.mxu1 %v6004_v31  ;;  %s6285_s9 = scalar_lea.vmem %s5156_s8, 768  ;;  %p6290_p1 = scmp.lt.s32.totalorder %s5156_s8, %s5156_s8 }
 0x369   :  { %v4672_v5 = vpop.f32.mrb[80].mxu0  ;;  %6007 = vmatpush3.bf16.msra.mxu1 %v6004_v31  ;;  %p6286_p0 = scmp.ne.s32.totalorder %s5156_s8, %s6285_s9  ;;  %p6291_p2 = scmp.lt.s32.totalorder %s6285_s9, %s6285_s9 }
 0x36a   :  { %v4985_v59 = vmax.f32 %v4979_v55, 0.0  ;;  %v4897_v25 = vmax.f32 %v4891_v60, %v4672_v5  ;;  %v4674_v21 = vpop.f32.mrb[81].mxu0  ;;  %v4980_v45 = vadd.f32 %v4969_v43, %v4902_v42  ;;  %v5012_v12 = vpop.permute.xlu1 %5011 }
 0x36b   :  { %p6292_p3 = por %p6291_p2, %p6290_p1 }
 0x36c   :  { %v6008_v16 = vpack.c.bf16 %v4985_v59, %v4984_v22  ;;  %v4903_v14 = vmax.f32 %v4897_v25, %v4674_v21  ;;  %v4986_v27 = vmax.f32 %v4980_v45, 0.0 }
 0x36d   :  { %p6293_p4 = pnand %p6292_p3, %p6286_p0 }
 0x36e   :  { %v4981_v18 = vadd.f32 %v4974_v46, %v4903_v14  ;;  %6009 = vmatprep.subr.bf16.mxu1 %v6008_v16 }
 0x36f   :  { %6011 = vmatpush3.bf16.msra.mxu1 %v6008_v16 }
 0x370   :  { %v4987_v19 = vmax.f32 %v4981_v18, 0.0 }
 0x372   :  { %v6012_v48 = vpack.c.bf16 %v4987_v19, %v4986_v27 }
 0x374   :  { %6013 = vmatprep.subr.bf16.mxu1 %v6012_v48 }
 0x375   :  { %6015 = vmatpush3.bf16.msra.mxu1 %v6012_v48 }
 0x378   :  { %5752 = vmatmul.mubr.msk.f32.vlgmr.msra.gmra.mrb[106].mxu1 %vm5018_vm11, %v4989_v20 }
 0x379   :  { %5754 = vmatprep.mubr.msk.f32.mxu1 %vm5018_vm11, %v4990_v33 }
 0x37c   :  { %5755 = vmatmul.mubr.msk.f32.gmra.mrb[108].mxu1 %vm5018_vm11, %v4991_v38 }
 0x37d   :  { %5757 = vmatprep.mubr.msk.f32.mxu1 %vm5018_vm11, %v4992_v49 }
 0x380   :  { %5758 = vmatmul.mubr.msk.f32.gmra.mrb[110].mxu1 %vm5018_vm11, %v4993_v30 }
 0x44b   :  { %v5753_v51 = vpop.f32.mrb[106].mxu1 }
 0x44c   :  { %v5109_v3 = vadd.f32 %v5753_v51, %v5000_v50  ;;  %v5103_v54 = vpop.f32.mrb[107].mxu1 }
 0x44d   :  { %v5104_v41 = vadd.f32 %v5103_v54, %v4996_v44 }
 0x44e   :  { %v5133_v47 = vmax.f32 %v5109_v3, 0.0 }
 0x44f   :  { %v5132_v58 = vmax.f32 %v5104_v41, 0.0  ;;  %v5756_v52 = vpop.f32.mrb[108].mxu1 }
 0x450   :  { %v5139_v60 = vadd.f32 %v5133_v47, %v4983_v28  ;;  %v5119_v61 = vadd.f32 %v5756_v52, %v5008_v56  ;;  %v5113_v62 = vpop.f32.mrb[109].mxu1 }
 0x451   :  { %v5138_v1 = vadd.f32 %v5132_v58, %v4982_v17  ;;  %v5114_v15 = vadd.f32 %v5113_v62, %v5004_v57 }
 0x452   :  { %5145 = vst [vmem:[#allocation2 + $0x8] sm:$0xff] %v5139_v60  ;;  %v5135_v63 = vmax.f32 %v5119_v61, 0.0 }
 0x453   :  { %5144 = vst [vmem:[#allocation2] sm:$0xff] %v5138_v1  ;;  %v5134_v0 = vmax.f32 %v5114_v15, 0.0  ;;  %v5759_v6 = vpop.f32.mrb[110].mxu1 }
 0x454   :  { %v5141_v7 = vadd.f32 %v5135_v63, %v4985_v59  ;;  %v5129_v8 = vadd.f32 %v5759_v6, %v5016_v10  ;;  %v5123_v34 = vpop.f32.mrb[111].mxu1 }
 0x455   :  { %v5140_v26 = vadd.f32 %v5134_v0, %v4984_v22  ;;  %v5124_v36 = vadd.f32 %v5123_v34, %v5012_v12 }
 0x456   :  { %5147 = vst [vmem:[#allocation2 + $0x18] sm:$0xff] %v5141_v7  ;;  %v5137_v23 = vmax.f32 %v5129_v8, 0.0 }
 0x457   :  { %5146 = vst [vmem:[#allocation2 + $0x10] sm:$0xff] %v5140_v26  ;;  %v5136_v29 = vmax.f32 %v5124_v36, 0.0 }
 0x458   :  { %v5143_v2 = vadd.f32 %v5137_v23, %v4987_v19 }
 0x459   :  { %v5142_v32 = vadd.f32 %v5136_v29, %v4986_v27 }
 0x45a   :  { %5149 = vst [vmem:[#allocation2 + $0x28] sm:$0xff] %v5143_v2 }
 0x45b   :  { %5148 = vst [vmem:[#allocation2 + $0x20] sm:$0xff] %v5142_v32 }
 0x45c   :  { %6296 = shalt.err (!%p6293_p4)
}
 0x45d   :  { %s6297_s12 = scalar_lea.hbm %s8460_s5, 768 }
 0x45e   :  { %p6298_p5 = scmp.ne.s32.totalorder %s8460_s5, %s6297_s12  ;;  %p6301_p6 = scmp.lt.u32.totalorder %s6297_s12, %s8460_s5 }
 0x460   :  { %p6303_p7 = pnand %p6301_p6, %p6298_p5 }
 0x462   :  { %6306 = shalt.err (!%p6303_p7)
}
 0x463   :  { %s6314_s17 = smov 128   ;;  %s6315_s18 = smov 8  }
 0x464   :  { %5161 = dma.vmem_to_hbm [thread:$0]  %s5156_s8, 768, %s8460_s5, [#allocation3], %s6314_s17, %s6314_s17, %s6315_s18  }
 0x465   :  { %6307 = dma.done.wait [#allocation3], 768  }
 0x466   :  { %6308 = vsyncadd [#allocation3], 4294966528 }
 0x467   :  { %5165 = vsyncpa [#allocation3], 1 }

</bundles_post_ra>
